<compile_context>
chip_gen: v5e
topology: v5e:2x2
jax: 0.10.0
libtpu: 0.0.40
codegen_flags: <defaults>
</compile_context>

<pallas_src>
import functools
from collections import OrderedDict

import jax
import jax.numpy as jnp
from jax.experimental import pallas as pl
from jax.experimental.pallas import tpu as pltpu

# ---------------- channel configuration (synthetic submodules) ---------------
C_IN = 4                         # image channels
C_LAT = 8                        # encoder latent channels
C_C = C_LAT * 3 // 4             # "common" 3/4 of the latent (6)
C_U = C_LAT - C_C                # "unique" 1/4 of the latent (2)
C_SKIP = 4                       # skip-feature channels
C_MAP = 4                        # map-feature channels (unused by decoders)
C_SEG = 1                        # segmentation channels
C_ENC = C_LAT + C_SKIP + C_MAP   # fused encoder output channels (16)

LANE_TILE = 256                  # pixel (lane) tile; grid axis is "parallel"


# ------------------------------ fused kernel ---------------------------------

def _fused_forward_kernel(
    # inputs: per-pixel data channels-first (C, tile) with pixels on lanes
    x_sat_ref, x_ta_ref, x_tb_ref, u_samp_ref,
    # weights (Cout, Cin) so y = W @ x is lane-dense over pixels
    w_enc_ref, b_enc_ref,        # (C_ENC, C_IN), (C_ENC, 1)
    w_dc_ref, b_dc_ref,          # (C_IN, C_C + C_SKIP), (C_IN, 1)
    w_dr_ref, b_dr_ref,          # (C_IN, C_LAT + C_SKIP), (C_IN, 1)
    w_seg_ref, b_seg_ref,        # (C_SEG, C_LAT), (C_SEG, 1)
    # outputs (all (C, tile), lane-dense)
    x_sat_res_ref, x_satm_ref,
    x_tatb_ref, x_ta_res_ref, x_tam_ref, x_tata_ref,
    x_tbtb_ref, x_tb_res_ref, x_tbta_ref,
    s_ta_ref, s_tatb_ref, s_tata_ref,
    s_tb_ref, s_tbtb_ref, s_tbta_ref,
):
    f32 = jnp.float32
    w_enc = w_enc_ref[...]
    b_enc = b_enc_ref[...]
    w_dc = w_dc_ref[...]
    b_dc = b_dc_ref[...]
    w_dr = w_dr_ref[...]
    b_dr = b_dr_ref[...]
    w_seg = w_seg_ref[...]
    b_seg = b_seg_ref[...]

    def encoder(x):
        # one fused matmul for the three encoder heads (s | skip | map)
        e = jnp.dot(w_enc, x, preferred_element_type=f32) + b_enc
        s = jnp.maximum(e[:C_LAT], 0.0)
        skip = jnp.maximum(e[C_LAT:C_LAT + C_SKIP], 0.0)
        fmap = e[C_LAT + C_SKIP:]   # API parity; synthetic decoders ignore it
        return s, skip, fmap

    def decoder_common(c, skip):
        y = (jnp.dot(w_dc[:, :C_C], c, preferred_element_type=f32)
             + jnp.dot(w_dc[:, C_C:], skip, preferred_element_type=f32)
             + b_dc)
        return jnp.tanh(y)

    def decoder_residual_parts(c, u, skip):
        # split-weight form avoids any channel concat inside/outside the kernel
        y = (jnp.dot(w_dr[:, :C_C], c, preferred_element_type=f32)
             + jnp.dot(w_dr[:, C_C:C_LAT], u, preferred_element_type=f32)
             + jnp.dot(w_dr[:, C_LAT:], skip, preferred_element_type=f32)
             + b_dr)
        return jnp.tanh(y)

    def decoder_residual(s, skip):
        return decoder_residual_parts(s[:C_C], s[C_C:], skip)

    def segmenter(s):
        # TODO(synk): `mode=1` selects a head in the original decoder-based
        # segmenter; this synthetic segmenter has a single head.
        y = jnp.dot(w_seg, s, preferred_element_type=f32) + b_seg
        return jax.nn.sigmoid(y)

    # ------------------------------ SAT branch -------------------------------
    s_sat, skip_sat, _ = encoder(x_sat_ref[...])
    x_sat_res_ref[...] = decoder_residual(s_sat, skip_sat)
    x_satm_ref[...] = segmenter(s_sat)

    # ------------------------------ TA branch --------------------------------
    s_ta, skip_ta, _ = encoder(x_ta_ref[...])
    s_ta_ref[...] = s_ta
    x_tam_ref[...] = segmenter(s_ta)
    # torch.cat([c_TA, u_TA], dim=1) == s_TA, so pass s_TA directly (no concat)
    x_ta_res = decoder_residual(s_ta, skip_ta)
    x_ta_res_ref[...] = x_ta_res
    x_tatb = decoder_common(s_ta[:C_C], skip_ta)
    x_tatb_ref[...] = x_tatb
    x_tata = x_tatb + x_ta_res                 # fused residual add (in VMEM)
    x_tata_ref[...] = x_tata
    s_tatb, _, _ = encoder(x_tatb)             # re-encode, still in VMEM
    s_tatb_ref[...] = s_tatb
    s_tata, _, _ = encoder(x_tata)
    s_tata_ref[...] = s_tata

    # ------------------------------ TB branch --------------------------------
    s_tb, skip_tb, _ = encoder(x_tb_ref[...])
    s_tb_ref[...] = s_tb
    # decoder_residual(cat([c_TB, u_TB_sampled]), skip_TB) via split weights
    x_tb_res = decoder_residual_parts(s_tb[:C_C], u_samp_ref[...], skip_tb)
    x_tb_res_ref[...] = x_tb_res
    x_tbtb = decoder_common(s_tb[:C_C], skip_tb)
    x_tbtb_ref[...] = x_tbtb
    x_tbta = x_tbtb + x_tb_res
    x_tbta_ref[...] = x_tbta
    s_tbtb, _, _ = encoder(x_tbtb)
    s_tbtb_ref[...] = s_tbtb
    s_tbta, _, _ = encoder(x_tbta)
    s_tbta_ref[...] = s_tbta


# ------------------------------ layout helpers --------------------------------

def _to_cr(x):
    """(N,H,W,C) -> (C, N*H*W): pixel axis becomes the lane (last) dimension."""
    n, h, w, c = x.shape
    return x.reshape(n * h * w, c).T


def _from_cr(y, n, h, w):
    """(C, N*H*W) -> (N,H,W,C)."""
    return y.T.reshape(n, h, w, y.shape[0])


_OUT_CHANNELS = (
    C_IN, C_SEG,                      # x_SAT_residual, x_SATM
    C_IN, C_IN, C_SEG, C_IN,          # x_TATB, x_TA_residual, x_TAM, x_TATA
    C_IN, C_IN, C_IN,                 # x_TBTB, x_TB_residual, x_TBTA
    C_LAT, C_LAT, C_LAT,              # s_TA, s_TATB, s_TATA
    C_LAT, C_LAT, C_LAT,              # s_TB, s_TBTB, s_TBTA
)


def fused_forward(p, x_sat, x_ta, x_tb, u_samp):
    """Single pallas_call running the whole forward graph in VMEM."""
    n, h, w, _ = x_sat.shape
    r = n * h * w
    if r % LANE_TILE == 0:
        tile = LANE_TILE            # 2 lane-tiles -> both v7x TCs get work
    elif r % 128 == 0:
        tile = 128
    else:
        tile = r
    grid = (r // tile,)

    def pix_spec(c):
        return pl.BlockSpec((c, tile), lambda i: (0, i))

    def full_spec(arr):
        return pl.BlockSpec(arr.shape, lambda i: (0, 0))

    in_specs = [
        pix_spec(C_IN), pix_spec(C_IN), pix_spec(C_IN), pix_spec(C_U),
        full_spec(p["W_enc"]), full_spec(p["b_enc"]),
        full_spec(p["W_dc"]), full_spec(p["b_dc"]),
        full_spec(p["W_dr"]), full_spec(p["b_dr"]),
        full_spec(p["W_seg"]), full_spec(p["b_seg"]),
    ]
    out_shape = tuple(
        jax.ShapeDtypeStruct((c, r), jnp.float32) for c in _OUT_CHANNELS)
    out_specs = tuple(pix_spec(c) for c in _OUT_CHANNELS)

    return pl.pallas_call(
        _fused_forward_kernel,
        out_shape=out_shape,
        grid=grid,
        in_specs=in_specs,
        out_specs=out_specs,
        compiler_params=pltpu.CompilerParams(
            dimension_semantics=("parallel",)),
    )(_to_cr(x_sat), _to_cr(x_ta), _to_cr(x_tb), _to_cr(u_samp),
      p["W_enc"], p["b_enc"], p["W_dc"], p["b_dc"],
      p["W_dr"], p["b_dr"], p["W_seg"], p["b_seg"])


# --------------------------- synthetic parameters -----------------------------

def init_params(key):
    ks = jax.random.split(key, 4)
    s = 0.1
    return {
        # fused encoder: rows [0:C_LAT]=s head, [C_LAT:C_LAT+C_SKIP]=skip head,
        # [C_LAT+C_SKIP:]=map head (unused downstream).
        "W_enc": s * jax.random.normal(ks[0], (C_ENC, C_IN), jnp.float32),
        "b_enc": jnp.zeros((C_ENC, 1), jnp.float32),
        # decoder_common: cols [0:C_C]=latent(common part), [C_C:]=skip
        "W_dc": s * jax.random.normal(ks[1], (C_IN, C_C + C_SKIP), jnp.float32),
        "b_dc": jnp.zeros((C_IN, 1), jnp.float32),
        # decoder_residual: cols [0:C_LAT]=latent(full), [C_LAT:]=skip
        "W_dr": s * jax.random.normal(ks[2], (C_IN, C_LAT + C_SKIP), jnp.float32),
        "b_dr": jnp.zeros((C_IN, 1), jnp.float32),
        # segmenter
        "W_seg": s * jax.random.normal(ks[3], (C_SEG, C_LAT), jnp.float32),
        "b_seg": jnp.zeros((C_SEG, 1), jnp.float32),
    }


# --------------------------------- _forward -----------------------------------

@functools.partial(jax.jit, static_argnames=("lambda_seg",))
def forward(p, x_SAT, x_TA, x_TB, rng_key, lambda_seg=1):
    n, h, w, _ = x_TA.shape
    # TODO(synk): original samples noise from a numpy RandomState on the host;
    # here we use jax.random.normal with an explicit key (same distribution).
    u_TB_sampled = jax.random.normal(rng_key, (n, h, w, C_U), jnp.float32)

    (x_sat_res, x_satm, x_tatb, x_ta_res, x_tam, x_tata,
     x_tbtb, x_tb_res, x_tbta,
     s_ta, s_tatb, s_tata, s_tb, s_tbtb, s_tbta) = fused_forward(
         p, x_SAT, x_TA, x_TB, u_TB_sampled)

    back = lambda y: _from_cr(y, n, h, w)

    x_SAT_residual = back(x_sat_res)
    x_TATB, x_TA_residual, x_TATA = back(x_tatb), back(x_ta_res), back(x_tata)
    x_TBTB, x_TB_residual, x_TBTA = back(x_tbtb), back(x_tb_res), back(x_tbta)

    def split_cu(s_cr):
        s_nhwc = back(s_cr)
        return s_nhwc[..., :C_C], s_nhwc[..., C_C:]

    c_TA, u_TA = split_cu(s_ta)
    c_TATB, _ = split_cu(s_tatb)
    c_TATA, u_TATA = split_cu(s_tata)
    c_TB, u_TB = split_cu(s_tb)
    c_TBTB, _ = split_cu(s_tbtb)
    c_TBTA, u_TBTA = split_cu(s_tbta)

    x_SATM = back(x_satm) if lambda_seg else None
    x_TAM = back(x_tam) if lambda_seg else None

    visible = OrderedDict((
        ("x_SAT", x_SAT), ("x_SAT_residual", x_SAT_residual), ("x_SATM", x_SATM),
        ("x_TA", x_TA), ("x_TATB", x_TATB), ("x_TA_residual", x_TA_residual),
        ("x_TAM", x_TAM), ("x_TATA", x_TATA),
        ("x_TB", x_TB), ("x_TBTB", x_TBTB), ("x_TB_residual", x_TB_residual),
        ("x_TBTA", x_TBTA)))
    hidden = OrderedDict((
        ("c_TA", c_TA), ("u_TA", u_TA), ("c_TATB", c_TATB), ("c_TATA", c_TATA),
        ("u_TATA", u_TATA), ("c_TB", c_TB), ("u_TB", u_TB),
        ("u_TB_sampled", u_TB_sampled), ("c_TBTB", c_TBTB), ("c_TBTA", c_TBTA),
        ("u_TBTA", u_TBTA)))
    return visible, hidden


# ----------------------------------- main --------------------------------------

if __name__ == "__main__":
    key = jax.random.PRNGKey(0)
    k_par, k_sat, k_ta, k_tb, k_z = jax.random.split(key, 5)

    params = init_params(k_par)

    N, H, W = 2, 16, 16
    x_SAT = jax.random.normal(k_sat, (N, H, W, C_IN), jnp.float32)
    x_TA = jax.random.normal(k_ta, (N, H, W, C_IN), jnp.float32)
    x_TB = jax.random.normal(k_tb, (N, H, W, C_IN), jnp.float32)

    visible, hidden = forward(params, x_SAT, x_TA, x_TB, k_z, lambda_seg=1)

    for d in (visible, hidden):
        for v in d.values():
            if v is not None:
                jax.block_until_ready(v)

    print("KERNEL_OK")
</pallas_src>

<mosaic_0001>
module attributes {stable_mosaic.version = 11 : i64} {
  func.func @_fused_forward_kernel(%arg0: i32, %arg1: memref<4x256xf32, #tpu.memory_space<vmem>>, %arg2: memref<4x256xf32, #tpu.memory_space<vmem>>, %arg3: memref<4x256xf32, #tpu.memory_space<vmem>>, %arg4: memref<2x256xf32, #tpu.memory_space<vmem>>, %arg5: memref<16x4xf32, #tpu.memory_space<vmem>>, %arg6: memref<16x1xf32, #tpu.memory_space<vmem>>, %arg7: memref<4x10xf32, #tpu.memory_space<vmem>>, %arg8: memref<4x1xf32, #tpu.memory_space<vmem>>, %arg9: memref<4x12xf32, #tpu.memory_space<vmem>>, %arg10: memref<4x1xf32, #tpu.memory_space<vmem>>, %arg11: memref<1x8xf32, #tpu.memory_space<vmem>>, %arg12: memref<1x1xf32, #tpu.memory_space<vmem>>, %arg13: memref<4x256xf32, #tpu.memory_space<vmem>>, %arg14: memref<1x256xf32, #tpu.memory_space<vmem>>, %arg15: memref<4x256xf32, #tpu.memory_space<vmem>>, %arg16: memref<4x256xf32, #tpu.memory_space<vmem>>, %arg17: memref<1x256xf32, #tpu.memory_space<vmem>>, %arg18: memref<4x256xf32, #tpu.memory_space<vmem>>, %arg19: memref<4x256xf32, #tpu.memory_space<vmem>>, %arg20: memref<4x256xf32, #tpu.memory_space<vmem>>, %arg21: memref<4x256xf32, #tpu.memory_space<vmem>>, %arg22: memref<8x256xf32, #tpu.memory_space<vmem>>, %arg23: memref<8x256xf32, #tpu.memory_space<vmem>>, %arg24: memref<8x256xf32, #tpu.memory_space<vmem>>, %arg25: memref<8x256xf32, #tpu.memory_space<vmem>>, %arg26: memref<8x256xf32, #tpu.memory_space<vmem>>, %arg27: memref<8x256xf32, #tpu.memory_space<vmem>>) attributes {dimension_semantics = [#tpu.dimension_semantics<parallel>], iteration_bounds = array<i64: 2>, scalar_prefetch = 0 : i64, scratch_operands = 0 : i64, tpu.core_type = #tpu.core_type<tc>, window_params = [{transform_indices = @transform_0, window_bounds = array<i64: 4, 256>}, {transform_indices = @transform_1, window_bounds = array<i64: 4, 256>}, {transform_indices = @transform_2, window_bounds = array<i64: 4, 256>}, {transform_indices = @transform_3, window_bounds = array<i64: 2, 256>}, {pipeline_mode = #tpu.pipeline_mode<synchronous>, transform_indices = @transform_4, window_bounds = array<i64: 16, 4>}, {pipeline_mode = #tpu.pipeline_mode<synchronous>, transform_indices = @transform_5, window_bounds = array<i64: 16, 1>}, {pipeline_mode = #tpu.pipeline_mode<synchronous>, transform_indices = @transform_6, window_bounds = array<i64: 4, 10>}, {pipeline_mode = #tpu.pipeline_mode<synchronous>, transform_indices = @transform_7, window_bounds = array<i64: 4, 1>}, {pipeline_mode = #tpu.pipeline_mode<synchronous>, transform_indices = @transform_8, window_bounds = array<i64: 4, 12>}, {pipeline_mode = #tpu.pipeline_mode<synchronous>, transform_indices = @transform_9, window_bounds = array<i64: 4, 1>}, {pipeline_mode = #tpu.pipeline_mode<synchronous>, transform_indices = @transform_10, window_bounds = array<i64: 1, 8>}, {pipeline_mode = #tpu.pipeline_mode<synchronous>, transform_indices = @transform_11, window_bounds = array<i64: 1, 1>}, {transform_indices = @transform_12, window_bounds = array<i64: 4, 256>}, {transform_indices = @transform_13, window_bounds = array<i64: 1, 256>}, {transform_indices = @transform_14, window_bounds = array<i64: 4, 256>}, {transform_indices = @transform_15, window_bounds = array<i64: 4, 256>}, {transform_indices = @transform_16, window_bounds = array<i64: 1, 256>}, {transform_indices = @transform_17, window_bounds = array<i64: 4, 256>}, {transform_indices = @transform_18, window_bounds = array<i64: 4, 256>}, {transform_indices = @transform_19, window_bounds = array<i64: 4, 256>}, {transform_indices = @transform_20, window_bounds = array<i64: 4, 256>}, {transform_indices = @transform_21, window_bounds = array<i64: 8, 256>}, {transform_indices = @transform_22, window_bounds = array<i64: 8, 256>}, {transform_indices = @transform_23, window_bounds = array<i64: 8, 256>}, {transform_indices = @transform_24, window_bounds = array<i64: 8, 256>}, {transform_indices = @transform_25, window_bounds = array<i64: 8, 256>}, {transform_indices = @transform_26, window_bounds = array<i64: 8, 256>}]} {
    %c0 = arith.constant 0 : index
    %c0_0 = arith.constant 0 : index
    %0 = vector.load %arg5[%c0, %c0_0] : memref<16x4xf32, #tpu.memory_space<vmem>>, vector<16x4xf32>
    %c0_1 = arith.constant 0 : index
    %c0_2 = arith.constant 0 : index
    %1 = vector.load %arg6[%c0_1, %c0_2] : memref<16x1xf32, #tpu.memory_space<vmem>>, vector<16x1xf32>
    %c0_3 = arith.constant 0 : index
    %c0_4 = arith.constant 0 : index
    %2 = vector.load %arg7[%c0_3, %c0_4] : memref<4x10xf32, #tpu.memory_space<vmem>>, vector<4x10xf32>
    %c0_5 = arith.constant 0 : index
    %c0_6 = arith.constant 0 : index
    %3 = vector.load %arg8[%c0_5, %c0_6] : memref<4x1xf32, #tpu.memory_space<vmem>>, vector<4x1xf32>
    %c0_7 = arith.constant 0 : index
    %c0_8 = arith.constant 0 : index
    %4 = vector.load %arg9[%c0_7, %c0_8] : memref<4x12xf32, #tpu.memory_space<vmem>>, vector<4x12xf32>
    %c0_9 = arith.constant 0 : index
    %c0_10 = arith.constant 0 : index
    %5 = vector.load %arg10[%c0_9, %c0_10] : memref<4x1xf32, #tpu.memory_space<vmem>>, vector<4x1xf32>
    %c0_11 = arith.constant 0 : index
    %c0_12 = arith.constant 0 : index
    %6 = vector.load %arg11[%c0_11, %c0_12] : memref<1x8xf32, #tpu.memory_space<vmem>>, vector<1x8xf32>
    %c0_13 = arith.constant 0 : index
    %c0_14 = arith.constant 0 : index
    %7 = vector.load %arg12[%c0_13, %c0_14] : memref<1x1xf32, #tpu.memory_space<vmem>>, vector<1x1xf32>
    %c0_15 = arith.constant 0 : index
    %c0_16 = arith.constant 0 : index
    %8 = vector.load %arg1[%c0_15, %c0_16] : memref<4x256xf32, #tpu.memory_space<vmem>>, vector<4x256xf32>
    %cst = arith.constant dense<0.000000e+00> : vector<16x256xf32>
    %9 = tpu.matmul %0, %8, %cst {dimension_numbers = #tpu.dot_dimension_numbers<[1], [0], [0], [1], [0, 0, 1, 1], [], []>} : vector<16x4xf32>, vector<4x256xf32>, vector<16x256xf32> -> vector<16x256xf32>
    %10 = vector.broadcast %1 : vector<16x1xf32> to vector<16x256xf32>
    %11 = arith.addf %9, %10 : vector<16x256xf32>
    %12 = vector.extract_strided_slice %11 {offsets = [0, 0], sizes = [8, 256], strides = [1, 1]} : vector<16x256xf32> to vector<8x256xf32>
    %cst_17 = arith.constant 0.000000e+00 : f32
    %13 = vector.broadcast %cst_17 : f32 to vector<8x256xf32>
    %14 = arith.maximumf %12, %13 : vector<8x256xf32>
    %15 = vector.extract_strided_slice %11 {offsets = [8, 0], sizes = [4, 256], strides = [1, 1]} : vector<16x256xf32> to vector<4x256xf32>
    %cst_18 = arith.constant 0.000000e+00 : f32
    %16 = vector.broadcast %cst_18 : f32 to vector<4x256xf32>
    %17 = arith.maximumf %15, %16 : vector<4x256xf32>
    %18 = vector.extract_strided_slice %14 {offsets = [0, 0], sizes = [6, 256], strides = [1, 1]} : vector<8x256xf32> to vector<6x256xf32>
    %19 = vector.extract_strided_slice %14 {offsets = [6, 0], sizes = [2, 256], strides = [1, 1]} : vector<8x256xf32> to vector<2x256xf32>
    %20 = vector.extract_strided_slice %4 {offsets = [0, 0], sizes = [4, 6], strides = [1, 1]} : vector<4x12xf32> to vector<4x6xf32>
    %cst_19 = arith.constant dense<0.000000e+00> : vector<4x256xf32>
    %21 = tpu.matmul %20, %18, %cst_19 {dimension_numbers = #tpu.dot_dimension_numbers<[1], [0], [0], [1], [0, 0, 1, 1], [], []>} : vector<4x6xf32>, vector<6x256xf32>, vector<4x256xf32> -> vector<4x256xf32>
    %22 = vector.extract_strided_slice %4 {offsets = [0, 6], sizes = [4, 2], strides = [1, 1]} : vector<4x12xf32> to vector<4x2xf32>
    %cst_20 = arith.constant dense<0.000000e+00> : vector<4x256xf32>
    %23 = tpu.matmul %22, %19, %cst_20 {dimension_numbers = #tpu.dot_dimension_numbers<[1], [0], [0], [1], [0, 0, 1, 1], [], []>} : vector<4x2xf32>, vector<2x256xf32>, vector<4x256xf32> -> vector<4x256xf32>
    %24 = arith.addf %21, %23 : vector<4x256xf32>
    %25 = vector.extract_strided_slice %4 {offsets = [0, 8], sizes = [4, 4], strides = [1, 1]} : vector<4x12xf32> to vector<4x4xf32>
    %cst_21 = arith.constant dense<0.000000e+00> : vector<4x256xf32>
    %26 = tpu.matmul %25, %17, %cst_21 {dimension_numbers = #tpu.dot_dimension_numbers<[1], [0], [0], [1], [0, 0, 1, 1], [], []>} : vector<4x4xf32>, vector<4x256xf32>, vector<4x256xf32> -> vector<4x256xf32>
    %27 = arith.addf %24, %26 : vector<4x256xf32>
    %28 = vector.broadcast %5 : vector<4x1xf32> to vector<4x256xf32>
    %29 = arith.addf %27, %28 : vector<4x256xf32>
    %30 = math.tanh %29 : vector<4x256xf32>
    %c0_22 = arith.constant 0 : index
    %c0_23 = arith.constant 0 : index
    %31 = vector.load %arg13[%c0_22, %c0_23] : memref<4x256xf32, #tpu.memory_space<vmem>>, vector<4x256xf32>
    tpu.vector_store %arg13[%c0_22, %c0_23], %30 {strides = array<i32>} : memref<4x256xf32, #tpu.memory_space<vmem>>, vector<4x256xf32>,
    %cst_24 = arith.constant dense<0.000000e+00> : vector<1x256xf32>
    %32 = tpu.matmul %6, %14, %cst_24 {dimension_numbers = #tpu.dot_dimension_numbers<[1], [0], [0], [1], [0, 0, 1, 1], [], []>} : vector<1x8xf32>, vector<8x256xf32>, vector<1x256xf32> -> vector<1x256xf32>
    %33 = vector.broadcast %7 : vector<1x1xf32> to vector<1x256xf32>
    %34 = arith.addf %32, %33 : vector<1x256xf32>
    %35 = arith.negf %34 : vector<1x256xf32>
    %36 = math.exp %35 : vector<1x256xf32>
    %cst_25 = arith.constant 1.000000e+00 : f32
    %37 = vector.broadcast %cst_25 : f32 to vector<1x256xf32>
    %38 = arith.addf %37, %36 : vector<1x256xf32>
    %39 = arith.divf %37, %38 : vector<1x256xf32>
    %c0_26 = arith.constant 0 : index
    %c0_27 = arith.constant 0 : index
    %40 = vector.load %arg14[%c0_26, %c0_27] : memref<1x256xf32, #tpu.memory_space<vmem>>, vector<1x256xf32>
    tpu.vector_store %arg14[%c0_26, %c0_27], %39 {strides = array<i32>} : memref<1x256xf32, #tpu.memory_space<vmem>>, vector<1x256xf32>,
    %c0_28 = arith.constant 0 : index
    %c0_29 = arith.constant 0 : index
    %41 = vector.load %arg2[%c0_28, %c0_29] : memref<4x256xf32, #tpu.memory_space<vmem>>, vector<4x256xf32>
    %cst_30 = arith.constant dense<0.000000e+00> : vector<16x256xf32>
    %42 = tpu.matmul %0, %41, %cst_30 {dimension_numbers = #tpu.dot_dimension_numbers<[1], [0], [0], [1], [0, 0, 1, 1], [], []>} : vector<16x4xf32>, vector<4x256xf32>, vector<16x256xf32> -> vector<16x256xf32>
    %43 = vector.broadcast %1 : vector<16x1xf32> to vector<16x256xf32>
    %44 = arith.addf %42, %43 : vector<16x256xf32>
    %45 = vector.extract_strided_slice %44 {offsets = [0, 0], sizes = [8, 256], strides = [1, 1]} : vector<16x256xf32> to vector<8x256xf32>
    %cst_31 = arith.constant 0.000000e+00 : f32
    %46 = vector.broadcast %cst_31 : f32 to vector<8x256xf32>
    %47 = arith.maximumf %45, %46 : vector<8x256xf32>
    %48 = vector.extract_strided_slice %44 {offsets = [8, 0], sizes = [4, 256], strides = [1, 1]} : vector<16x256xf32> to vector<4x256xf32>
    %cst_32 = arith.constant 0.000000e+00 : f32
    %49 = vector.broadcast %cst_32 : f32 to vector<4x256xf32>
    %50 = arith.maximumf %48, %49 : vector<4x256xf32>
    %c0_33 = arith.constant 0 : index
    %c0_34 = arith.constant 0 : index
    %51 = vector.load %arg22[%c0_33, %c0_34] : memref<8x256xf32, #tpu.memory_space<vmem>>, vector<8x256xf32>
    tpu.vector_store %arg22[%c0_33, %c0_34], %47 {strides = array<i32>} : memref<8x256xf32, #tpu.memory_space<vmem>>, vector<8x256xf32>,
    %cst_35 = arith.constant dense<0.000000e+00> : vector<1x256xf32>
    %52 = tpu.matmul %6, %47, %cst_35 {dimension_numbers = #tpu.dot_dimension_numbers<[1], [0], [0], [1], [0, 0, 1, 1], [], []>} : vector<1x8xf32>, vector<8x256xf32>, vector<1x256xf32> -> vector<1x256xf32>
    %53 = vector.broadcast %7 : vector<1x1xf32> to vector<1x256xf32>
    %54 = arith.addf %52, %53 : vector<1x256xf32>
    %55 = arith.negf %54 : vector<1x256xf32>
    %56 = math.exp %55 : vector<1x256xf32>
    %cst_36 = arith.constant 1.000000e+00 : f32
    %57 = vector.broadcast %cst_36 : f32 to vector<1x256xf32>
    %58 = arith.addf %57, %56 : vector<1x256xf32>
    %59 = arith.divf %57, %58 : vector<1x256xf32>
    %c0_37 = arith.constant 0 : index
    %c0_38 = arith.constant 0 : index
    %60 = vector.load %arg17[%c0_37, %c0_38] : memref<1x256xf32, #tpu.memory_space<vmem>>, vector<1x256xf32>
    tpu.vector_store %arg17[%c0_37, %c0_38], %59 {strides = array<i32>} : memref<1x256xf32, #tpu.memory_space<vmem>>, vector<1x256xf32>,
    %61 = vector.extract_strided_slice %47 {offsets = [0, 0], sizes = [6, 256], strides = [1, 1]} : vector<8x256xf32> to vector<6x256xf32>
    %62 = vector.extract_strided_slice %47 {offsets = [6, 0], sizes = [2, 256], strides = [1, 1]} : vector<8x256xf32> to vector<2x256xf32>
    %63 = vector.extract_strided_slice %4 {offsets = [0, 0], sizes = [4, 6], strides = [1, 1]} : vector<4x12xf32> to vector<4x6xf32>
    %cst_39 = arith.constant dense<0.000000e+00> : vector<4x256xf32>
    %64 = tpu.matmul %63, %61, %cst_39 {dimension_numbers = #tpu.dot_dimension_numbers<[1], [0], [0], [1], [0, 0, 1, 1], [], []>} : vector<4x6xf32>, vector<6x256xf32>, vector<4x256xf32> -> vector<4x256xf32>
    %65 = vector.extract_strided_slice %4 {offsets = [0, 6], sizes = [4, 2], strides = [1, 1]} : vector<4x12xf32> to vector<4x2xf32>
    %cst_40 = arith.constant dense<0.000000e+00> : vector<4x256xf32>
    %66 = tpu.matmul %65, %62, %cst_40 {dimension_numbers = #tpu.dot_dimension_numbers<[1], [0], [0], [1], [0, 0, 1, 1], [], []>} : vector<4x2xf32>, vector<2x256xf32>, vector<4x256xf32> -> vector<4x256xf32>
    %67 = arith.addf %64, %66 : vector<4x256xf32>
    %68 = vector.extract_strided_slice %4 {offsets = [0, 8], sizes = [4, 4], strides = [1, 1]} : vector<4x12xf32> to vector<4x4xf32>
    %cst_41 = arith.constant dense<0.000000e+00> : vector<4x256xf32>
    %69 = tpu.matmul %68, %50, %cst_41 {dimension_numbers = #tpu.dot_dimension_numbers<[1], [0], [0], [1], [0, 0, 1, 1], [], []>} : vector<4x4xf32>, vector<4x256xf32>, vector<4x256xf32> -> vector<4x256xf32>
    %70 = arith.addf %67, %69 : vector<4x256xf32>
    %71 = vector.broadcast %5 : vector<4x1xf32> to vector<4x256xf32>
    %72 = arith.addf %70, %71 : vector<4x256xf32>
    %73 = math.tanh %72 : vector<4x256xf32>
    %c0_42 = arith.constant 0 : index
    %c0_43 = arith.constant 0 : index
    %74 = vector.load %arg16[%c0_42, %c0_43] : memref<4x256xf32, #tpu.memory_space<vmem>>, vector<4x256xf32>
    tpu.vector_store %arg16[%c0_42, %c0_43], %73 {strides = array<i32>} : memref<4x256xf32, #tpu.memory_space<vmem>>, vector<4x256xf32>,
    %75 = vector.extract_strided_slice %47 {offsets = [0, 0], sizes = [6, 256], strides = [1, 1]} : vector<8x256xf32> to vector<6x256xf32>
    %76 = vector.extract_strided_slice %2 {offsets = [0, 0], sizes = [4, 6], strides = [1, 1]} : vector<4x10xf32> to vector<4x6xf32>
    %cst_44 = arith.constant dense<0.000000e+00> : vector<4x256xf32>
    %77 = tpu.matmul %76, %75, %cst_44 {dimension_numbers = #tpu.dot_dimension_numbers<[1], [0], [0], [1], [0, 0, 1, 1], [], []>} : vector<4x6xf32>, vector<6x256xf32>, vector<4x256xf32> -> vector<4x256xf32>
    %78 = vector.extract_strided_slice %2 {offsets = [0, 6], sizes = [4, 4], strides = [1, 1]} : vector<4x10xf32> to vector<4x4xf32>
    %cst_45 = arith.constant dense<0.000000e+00> : vector<4x256xf32>
    %79 = tpu.matmul %78, %50, %cst_45 {dimension_numbers = #tpu.dot_dimension_numbers<[1], [0], [0], [1], [0, 0, 1, 1], [], []>} : vector<4x4xf32>, vector<4x256xf32>, vector<4x256xf32> -> vector<4x256xf32>
    %80 = arith.addf %77, %79 : vector<4x256xf32>
    %81 = vector.broadcast %3 : vector<4x1xf32> to vector<4x256xf32>
    %82 = arith.addf %80, %81 : vector<4x256xf32>
    %83 = math.tanh %82 : vector<4x256xf32>
    %c0_46 = arith.constant 0 : index
    %c0_47 = arith.constant 0 : index
    %84 = vector.load %arg15[%c0_46, %c0_47] : memref<4x256xf32, #tpu.memory_space<vmem>>, vector<4x256xf32>
    tpu.vector_store %arg15[%c0_46, %c0_47], %83 {strides = array<i32>} : memref<4x256xf32, #tpu.memory_space<vmem>>, vector<4x256xf32>,
    %85 = arith.addf %83, %73 : vector<4x256xf32>
    %c0_48 = arith.constant 0 : index
    %c0_49 = arith.constant 0 : index
    %86 = vector.load %arg18[%c0_48, %c0_49] : memref<4x256xf32, #tpu.memory_space<vmem>>, vector<4x256xf32>
    tpu.vector_store %arg18[%c0_48, %c0_49], %85 {strides = array<i32>} : memref<4x256xf32, #tpu.memory_space<vmem>>, vector<4x256xf32>,
    %cst_50 = arith.constant dense<0.000000e+00> : vector<16x256xf32>
    %87 = tpu.matmul %0, %83, %cst_50 {dimension_numbers = #tpu.dot_dimension_numbers<[1], [0], [0], [1], [0, 0, 1, 1], [], []>} : vector<16x4xf32>, vector<4x256xf32>, vector<16x256xf32> -> vector<16x256xf32>
    %88 = vector.broadcast %1 : vector<16x1xf32> to vector<16x256xf32>
    %89 = arith.addf %87, %88 : vector<16x256xf32>
    %90 = vector.extract_strided_slice %89 {offsets = [0, 0], sizes = [8, 256], strides = [1, 1]} : vector<16x256xf32> to vector<8x256xf32>
    %cst_51 = arith.constant 0.000000e+00 : f32
    %91 = vector.broadcast %cst_51 : f32 to vector<8x256xf32>
    %92 = arith.maximumf %90, %91 : vector<8x256xf32>
    %c0_52 = arith.constant 0 : index
    %c0_53 = arith.constant 0 : index
    %93 = vector.load %arg23[%c0_52, %c0_53] : memref<8x256xf32, #tpu.memory_space<vmem>>, vector<8x256xf32>
    tpu.vector_store %arg23[%c0_52, %c0_53], %92 {strides = array<i32>} : memref<8x256xf32, #tpu.memory_space<vmem>>, vector<8x256xf32>,
    %cst_54 = arith.constant dense<0.000000e+00> : vector<16x256xf32>
    %94 = tpu.matmul %0, %85, %cst_54 {dimension_numbers = #tpu.dot_dimension_numbers<[1], [0], [0], [1], [0, 0, 1, 1], [], []>} : vector<16x4xf32>, vector<4x256xf32>, vector<16x256xf32> -> vector<16x256xf32>
    %95 = vector.broadcast %1 : vector<16x1xf32> to vector<16x256xf32>
    %96 = arith.addf %94, %95 : vector<16x256xf32>
    %97 = vector.extract_strided_slice %96 {offsets = [0, 0], sizes = [8, 256], strides = [1, 1]} : vector<16x256xf32> to vector<8x256xf32>
    %cst_55 = arith.constant 0.000000e+00 : f32
    %98 = vector.broadcast %cst_55 : f32 to vector<8x256xf32>
    %99 = arith.maximumf %97, %98 : vector<8x256xf32>
    %c0_56 = arith.constant 0 : index
    %c0_57 = arith.constant 0 : index
    %100 = vector.load %arg24[%c0_56, %c0_57] : memref<8x256xf32, #tpu.memory_space<vmem>>, vector<8x256xf32>
    tpu.vector_store %arg24[%c0_56, %c0_57], %99 {strides = array<i32>} : memref<8x256xf32, #tpu.memory_space<vmem>>, vector<8x256xf32>,
    %c0_58 = arith.constant 0 : index
    %c0_59 = arith.constant 0 : index
    %101 = vector.load %arg3[%c0_58, %c0_59] : memref<4x256xf32, #tpu.memory_space<vmem>>, vector<4x256xf32>
    %cst_60 = arith.constant dense<0.000000e+00> : vector<16x256xf32>
    %102 = tpu.matmul %0, %101, %cst_60 {dimension_numbers = #tpu.dot_dimension_numbers<[1], [0], [0], [1], [0, 0, 1, 1], [], []>} : vector<16x4xf32>, vector<4x256xf32>, vector<16x256xf32> -> vector<16x256xf32>
    %103 = vector.broadcast %1 : vector<16x1xf32> to vector<16x256xf32>
    %104 = arith.addf %102, %103 : vector<16x256xf32>
    %105 = vector.extract_strided_slice %104 {offsets = [0, 0], sizes = [8, 256], strides = [1, 1]} : vector<16x256xf32> to vector<8x256xf32>
    %cst_61 = arith.constant 0.000000e+00 : f32
    %106 = vector.broadcast %cst_61 : f32 to vector<8x256xf32>
    %107 = arith.maximumf %105, %106 : vector<8x256xf32>
    %108 = vector.extract_strided_slice %104 {offsets = [8, 0], sizes = [4, 256], strides = [1, 1]} : vector<16x256xf32> to vector<4x256xf32>
    %cst_62 = arith.constant 0.000000e+00 : f32
    %109 = vector.broadcast %cst_62 : f32 to vector<4x256xf32>
    %110 = arith.maximumf %108, %109 : vector<4x256xf32>
    %c0_63 = arith.constant 0 : index
    %c0_64 = arith.constant 0 : index
    %111 = vector.load %arg25[%c0_63, %c0_64] : memref<8x256xf32, #tpu.memory_space<vmem>>, vector<8x256xf32>
    tpu.vector_store %arg25[%c0_63, %c0_64], %107 {strides = array<i32>} : memref<8x256xf32, #tpu.memory_space<vmem>>, vector<8x256xf32>,
    %112 = vector.extract_strided_slice %107 {offsets = [0, 0], sizes = [6, 256], strides = [1, 1]} : vector<8x256xf32> to vector<6x256xf32>
    %c0_65 = arith.constant 0 : index
    %c0_66 = arith.constant 0 : index
    %113 = vector.load %arg4[%c0_65, %c0_66] : memref<2x256xf32, #tpu.memory_space<vmem>>, vector<2x256xf32>
    %114 = vector.extract_strided_slice %4 {offsets = [0, 0], sizes = [4, 6], strides = [1, 1]} : vector<4x12xf32> to vector<4x6xf32>
    %cst_67 = arith.constant dense<0.000000e+00> : vector<4x256xf32>
    %115 = tpu.matmul %114, %112, %cst_67 {dimension_numbers = #tpu.dot_dimension_numbers<[1], [0], [0], [1], [0, 0, 1, 1], [], []>} : vector<4x6xf32>, vector<6x256xf32>, vector<4x256xf32> -> vector<4x256xf32>
    %116 = vector.extract_strided_slice %4 {offsets = [0, 6], sizes = [4, 2], strides = [1, 1]} : vector<4x12xf32> to vector<4x2xf32>
    %cst_68 = arith.constant dense<0.000000e+00> : vector<4x256xf32>
    %117 = tpu.matmul %116, %113, %cst_68 {dimension_numbers = #tpu.dot_dimension_numbers<[1], [0], [0], [1], [0, 0, 1, 1], [], []>} : vector<4x2xf32>, vector<2x256xf32>, vector<4x256xf32> -> vector<4x256xf32>
    %118 = arith.addf %115, %117 : vector<4x256xf32>
    %119 = vector.extract_strided_slice %4 {offsets = [0, 8], sizes = [4, 4], strides = [1, 1]} : vector<4x12xf32> to vector<4x4xf32>
    %cst_69 = arith.constant dense<0.000000e+00> : vector<4x256xf32>
    %120 = tpu.matmul %119, %110, %cst_69 {dimension_numbers = #tpu.dot_dimension_numbers<[1], [0], [0], [1], [0, 0, 1, 1], [], []>} : vector<4x4xf32>, vector<4x256xf32>, vector<4x256xf32> -> vector<4x256xf32>
    %121 = arith.addf %118, %120 : vector<4x256xf32>
    %122 = vector.broadcast %5 : vector<4x1xf32> to vector<4x256xf32>
    %123 = arith.addf %121, %122 : vector<4x256xf32>
    %124 = math.tanh %123 : vector<4x256xf32>
    %c0_70 = arith.constant 0 : index
    %c0_71 = arith.constant 0 : index
    %125 = vector.load %arg20[%c0_70, %c0_71] : memref<4x256xf32, #tpu.memory_space<vmem>>, vector<4x256xf32>
    tpu.vector_store %arg20[%c0_70, %c0_71], %124 {strides = array<i32>} : memref<4x256xf32, #tpu.memory_space<vmem>>, vector<4x256xf32>,
    %126 = vector.extract_strided_slice %107 {offsets = [0, 0], sizes = [6, 256], strides = [1, 1]} : vector<8x256xf32> to vector<6x256xf32>
    %127 = vector.extract_strided_slice %2 {offsets = [0, 0], sizes = [4, 6], strides = [1, 1]} : vector<4x10xf32> to vector<4x6xf32>
    %cst_72 = arith.constant dense<0.000000e+00> : vector<4x256xf32>
    %128 = tpu.matmul %127, %126, %cst_72 {dimension_numbers = #tpu.dot_dimension_numbers<[1], [0], [0], [1], [0, 0, 1, 1], [], []>} : vector<4x6xf32>, vector<6x256xf32>, vector<4x256xf32> -> vector<4x256xf32>
    %129 = vector.extract_strided_slice %2 {offsets = [0, 6], sizes = [4, 4], strides = [1, 1]} : vector<4x10xf32> to vector<4x4xf32>
    %cst_73 = arith.constant dense<0.000000e+00> : vector<4x256xf32>
    %130 = tpu.matmul %129, %110, %cst_73 {dimension_numbers = #tpu.dot_dimension_numbers<[1], [0], [0], [1], [0, 0, 1, 1], [], []>} : vector<4x4xf32>, vector<4x256xf32>, vector<4x256xf32> -> vector<4x256xf32>
    %131 = arith.addf %128, %130 : vector<4x256xf32>
    %132 = vector.broadcast %3 : vector<4x1xf32> to vector<4x256xf32>
    %133 = arith.addf %131, %132 : vector<4x256xf32>
    %134 = math.tanh %133 : vector<4x256xf32>
    %c0_74 = arith.constant 0 : index
    %c0_75 = arith.constant 0 : index
    %135 = vector.load %arg19[%c0_74, %c0_75] : memref<4x256xf32, #tpu.memory_space<vmem>>, vector<4x256xf32>
    tpu.vector_store %arg19[%c0_74, %c0_75], %134 {strides = array<i32>} : memref<4x256xf32, #tpu.memory_space<vmem>>, vector<4x256xf32>,
    %136 = arith.addf %134, %124 : vector<4x256xf32>
    %c0_76 = arith.constant 0 : index
    %c0_77 = arith.constant 0 : index
    %137 = vector.load %arg21[%c0_76, %c0_77] : memref<4x256xf32, #tpu.memory_space<vmem>>, vector<4x256xf32>
    tpu.vector_store %arg21[%c0_76, %c0_77], %136 {strides = array<i32>} : memref<4x256xf32, #tpu.memory_space<vmem>>, vector<4x256xf32>,
    %cst_78 = arith.constant dense<0.000000e+00> : vector<16x256xf32>
    %138 = tpu.matmul %0, %134, %cst_78 {dimension_numbers = #tpu.dot_dimension_numbers<[1], [0], [0], [1], [0, 0, 1, 1], [], []>} : vector<16x4xf32>, vector<4x256xf32>, vector<16x256xf32> -> vector<16x256xf32>
    %139 = vector.broadcast %1 : vector<16x1xf32> to vector<16x256xf32>
    %140 = arith.addf %138, %139 : vector<16x256xf32>
    %141 = vector.extract_strided_slice %140 {offsets = [0, 0], sizes = [8, 256], strides = [1, 1]} : vector<16x256xf32> to vector<8x256xf32>
    %cst_79 = arith.constant 0.000000e+00 : f32
    %142 = vector.broadcast %cst_79 : f32 to vector<8x256xf32>
    %143 = arith.maximumf %141, %142 : vector<8x256xf32>
    %c0_80 = arith.constant 0 : index
    %c0_81 = arith.constant 0 : index
    %144 = vector.load %arg26[%c0_80, %c0_81] : memref<8x256xf32, #tpu.memory_space<vmem>>, vector<8x256xf32>
    tpu.vector_store %arg26[%c0_80, %c0_81], %143 {strides = array<i32>} : memref<8x256xf32, #tpu.memory_space<vmem>>, vector<8x256xf32>,
    %cst_82 = arith.constant dense<0.000000e+00> : vector<16x256xf32>
    %145 = tpu.matmul %0, %136, %cst_82 {dimension_numbers = #tpu.dot_dimension_numbers<[1], [0], [0], [1], [0, 0, 1, 1], [], []>} : vector<16x4xf32>, vector<4x256xf32>, vector<16x256xf32> -> vector<16x256xf32>
    %146 = vector.broadcast %1 : vector<16x1xf32> to vector<16x256xf32>
    %147 = arith.addf %145, %146 : vector<16x256xf32>
    %148 = vector.extract_strided_slice %147 {offsets = [0, 0], sizes = [8, 256], strides = [1, 1]} : vector<16x256xf32> to vector<8x256xf32>
    %cst_83 = arith.constant 0.000000e+00 : f32
    %149 = vector.broadcast %cst_83 : f32 to vector<8x256xf32>
    %150 = arith.maximumf %148, %149 : vector<8x256xf32>
    %c0_84 = arith.constant 0 : index
    %c0_85 = arith.constant 0 : index
    %151 = vector.load %arg27[%c0_84, %c0_85] : memref<8x256xf32, #tpu.memory_space<vmem>>, vector<8x256xf32>
    tpu.vector_store %arg27[%c0_84, %c0_85], %150 {strides = array<i32>} : memref<8x256xf32, #tpu.memory_space<vmem>>, vector<8x256xf32>,
    return
  }
  func.func @transform_0(%arg0: i32) -> (i32, i32) {
    %c0_i32 = arith.constant 0 : i32
    %c0_i32_0 = arith.constant 0 : i32
    return %c0_i32, %arg0 : i32, i32
  }
  func.func @transform_1(%arg0: i32) -> (i32, i32) {
    %c0_i32 = arith.constant 0 : i32
    %c0_i32_0 = arith.constant 0 : i32
    return %c0_i32, %arg0 : i32, i32
  }
  func.func @transform_2(%arg0: i32) -> (i32, i32) {
    %c0_i32 = arith.constant 0 : i32
    %c0_i32_0 = arith.constant 0 : i32
    return %c0_i32, %arg0 : i32, i32
  }
  func.func @transform_3(%arg0: i32) -> (i32, i32) {
    %c0_i32 = arith.constant 0 : i32
    %c0_i32_0 = arith.constant 0 : i32
    return %c0_i32, %arg0 : i32, i32
  }
  func.func @transform_4(%arg0: i32) -> (i32, i32) {
    %c0_i32 = arith.constant 0 : i32
    %c0_i32_0 = arith.constant 0 : i32
    %c0_i32_1 = arith.constant 0 : i32
    return %c0_i32, %c0_i32_0 : i32, i32
  }
  func.func @transform_5(%arg0: i32) -> (i32, i32) {
    %c0_i32 = arith.constant 0 : i32
    %c0_i32_0 = arith.constant 0 : i32
    %c0_i32_1 = arith.constant 0 : i32
    return %c0_i32, %c0_i32_0 : i32, i32
  }
  func.func @transform_6(%arg0: i32) -> (i32, i32) {
    %c0_i32 = arith.constant 0 : i32
    %c0_i32_0 = arith.constant 0 : i32
    %c0_i32_1 = arith.constant 0 : i32
    return %c0_i32, %c0_i32_0 : i32, i32
  }
  func.func @transform_7(%arg0: i32) -> (i32, i32) {
    %c0_i32 = arith.constant 0 : i32
    %c0_i32_0 = arith.constant 0 : i32
    %c0_i32_1 = arith.constant 0 : i32
    return %c0_i32, %c0_i32_0 : i32, i32
  }
  func.func @transform_8(%arg0: i32) -> (i32, i32) {
    %c0_i32 = arith.constant 0 : i32
    %c0_i32_0 = arith.constant 0 : i32
    %c0_i32_1 = arith.constant 0 : i32
    return %c0_i32, %c0_i32_0 : i32, i32
  }
  func.func @transform_9(%arg0: i32) -> (i32, i32) {
    %c0_i32 = arith.constant 0 : i32
    %c0_i32_0 = arith.constant 0 : i32
    %c0_i32_1 = arith.constant 0 : i32
    return %c0_i32, %c0_i32_0 : i32, i32
  }
  func.func @transform_10(%arg0: i32) -> (i32, i32) {
    %c0_i32 = arith.constant 0 : i32
    %c0_i32_0 = arith.constant 0 : i32
    %c0_i32_1 = arith.constant 0 : i32
    return %c0_i32, %c0_i32_0 : i32, i32
  }
  func.func @transform_11(%arg0: i32) -> (i32, i32) {
    %c0_i32 = arith.constant 0 : i32
    %c0_i32_0 = arith.constant 0 : i32
    %c0_i32_1 = arith.constant 0 : i32
    return %c0_i32, %c0_i32_0 : i32, i32
  }
  func.func @transform_12(%arg0: i32) -> (i32, i32) {
    %c0_i32 = arith.constant 0 : i32
    %c0_i32_0 = arith.constant 0 : i32
    return %c0_i32, %arg0 : i32, i32
  }
  func.func @transform_13(%arg0: i32) -> (i32, i32) {
    %c0_i32 = arith.constant 0 : i32
    %c0_i32_0 = arith.constant 0 : i32
    return %c0_i32, %arg0 : i32, i32
  }
  func.func @transform_14(%arg0: i32) -> (i32, i32) {
    %c0_i32 = arith.constant 0 : i32
    %c0_i32_0 = arith.constant 0 : i32
    return %c0_i32, %arg0 : i32, i32
  }
  func.func @transform_15(%arg0: i32) -> (i32, i32) {
    %c0_i32 = arith.constant 0 : i32
    %c0_i32_0 = arith.constant 0 : i32
    return %c0_i32, %arg0 : i32, i32
  }
  func.func @transform_16(%arg0: i32) -> (i32, i32) {
    %c0_i32 = arith.constant 0 : i32
    %c0_i32_0 = arith.constant 0 : i32
    return %c0_i32, %arg0 : i32, i32
  }
  func.func @transform_17(%arg0: i32) -> (i32, i32) {
    %c0_i32 = arith.constant 0 : i32
    %c0_i32_0 = arith.constant 0 : i32
    return %c0_i32, %arg0 : i32, i32
  }
  func.func @transform_18(%arg0: i32) -> (i32, i32) {
    %c0_i32 = arith.constant 0 : i32
    %c0_i32_0 = arith.constant 0 : i32
    return %c0_i32, %arg0 : i32, i32
  }
  func.func @transform_19(%arg0: i32) -> (i32, i32) {
    %c0_i32 = arith.constant 0 : i32
    %c0_i32_0 = arith.constant 0 : i32
    return %c0_i32, %arg0 : i32, i32
  }
  func.func @transform_20(%arg0: i32) -> (i32, i32) {
    %c0_i32 = arith.constant 0 : i32
    %c0_i32_0 = arith.constant 0 : i32
    return %c0_i32, %arg0 : i32, i32
  }
  func.func @transform_21(%arg0: i32) -> (i32, i32) {
    %c0_i32 = arith.constant 0 : i32
    %c0_i32_0 = arith.constant 0 : i32
    return %c0_i32, %arg0 : i32, i32
  }
  func.func @transform_22(%arg0: i32) -> (i32, i32) {
    %c0_i32 = arith.constant 0 : i32
    %c0_i32_0 = arith.constant 0 : i32
    return %c0_i32, %arg0 : i32, i32
  }
  func.func @transform_23(%arg0: i32) -> (i32, i32) {
    %c0_i32 = arith.constant 0 : i32
    %c0_i32_0 = arith.constant 0 : i32
    return %c0_i32, %arg0 : i32, i32
  }
  func.func @transform_24(%arg0: i32) -> (i32, i32) {
    %c0_i32 = arith.constant 0 : i32
    %c0_i32_0 = arith.constant 0 : i32
    return %c0_i32, %arg0 : i32, i32
  }
  func.func @transform_25(%arg0: i32) -> (i32, i32) {
    %c0_i32 = arith.constant 0 : i32
    %c0_i32_0 = arith.constant 0 : i32
    return %c0_i32, %arg0 : i32, i32
  }
  func.func @transform_26(%arg0: i32) -> (i32, i32) {
    %c0_i32 = arith.constant 0 : i32
    %c0_i32_0 = arith.constant 0 : i32
    return %c0_i32, %arg0 : i32, i32
  }
}

</mosaic_0001>

<bundles_post_ra>
// kernel: forward.1
= control target key start
LH: loop header
LB: loop body
LE: loop exit
PB: predicated region body
PF: predicated region fallthrough
CT: control target
= control target key end

     0   :  { %s3600_s0 = inlined_call_operand.vmem [shape: f32[4,512], index: 0, kind: input, shape index: {}]   ;;  %s3601_s1 = inlined_call_operand.vmem [shape: f32[4,512], index: 1, kind: input, shape index: {}]   ;;  %s3602_s2 = inlined_call_operand.vmem [shape: f32[4,512], index: 2, kind: input, shape index: {}]   ;;  %s3603_s3 = inlined_call_operand.vmem [shape: f32[2,512], index: 3, kind: input, shape index: {}]   ;;  %s3604_s4 = inlined_call_operand.vmem [shape: f32[16,4], index: 4, kind: input, shape index: {}]   ;;  %s3605_s5 = inlined_call_operand.vmem [shape: f32[16,1], index: 5, kind: input, shape index: {}]   ;;  %s3606_s6 = inlined_call_operand.vmem [shape: f32[4,10], index: 6, kind: input, shape index: {}]   ;;  %s3607_s7 = inlined_call_operand.vmem [shape: f32[4,1], index: 7, kind: input, shape index: {}]   ;;  %s3608_s8 = inlined_call_operand.vmem [shape: f32[4,12], index: 8, kind: input, shape index: {}]   ;;  %s3609_s9 = inlined_call_operand.vmem [shape: f32[4,1], index: 9, kind: input, shape index: {}]   ;;  %s3610_s10 = inlined_call_operand.vmem [shape: f32[1,8], index: 10, kind: input, shape index: {}]   ;;  %s3611_s11 = inlined_call_operand.<no memory space> [shape: f32[1,1], index: 11, kind: input, shape index: {}]   ;;  %s3612_s12 = inlined_call_operand.vmem [shape: f32[4,512], index: 12, kind: output, shape index: {0}]   ;;  %s3613_s13 = inlined_call_operand.vmem [shape: f32[1,512], index: 13, kind: output, shape index: {1}]   ;;  %s3614_s14 = inlined_call_operand.vmem [shape: f32[4,512], index: 14, kind: output, shape index: {2}]   ;;  %s3615_s15 = inlined_call_operand.vmem [shape: f32[4,512], index: 15, kind: output, shape index: {3}]   ;;  %s3616_s16 = inlined_call_operand.vmem [shape: f32[1,512], index: 16, kind: output, shape index: {4}]   ;;  %s3617_s17 = inlined_call_operand.vmem [shape: f32[4,512], index: 17, kind: output, shape index: {5}]   ;;  %s3618_s18 = inlined_call_operand.vmem [shape: f32[4,512], index: 18, kind: output, shape index: {6}]   ;;  %s3619_s19 = inlined_call_operand.vmem [shape: f32[4,512], index: 19, kind: output, shape index: {7}]   ;;  %s3620_s20 = inlined_call_operand.vmem [shape: f32[4,512], index: 20, kind: output, shape index: {8}]   ;;  %s3621_s21 = inlined_call_operand.vmem [shape: f32[8,512], index: 21, kind: output, shape index: {9}]   ;;  %s3622_s22 = inlined_call_operand.vmem [shape: f32[8,512], index: 22, kind: output, shape index: {10}]   ;;  %s3623_s23 = inlined_call_operand.vmem [shape: f32[8,512], index: 23, kind: output, shape index: {11}]   ;;  %s3624_s24 = inlined_call_operand.vmem [shape: f32[8,512], index: 24, kind: output, shape index: {12}]   ;;  %s3625_s25 = inlined_call_operand.vmem [shape: f32[8,512], index: 25, kind: output, shape index: {13}]   ;;  %s3626_s26 = inlined_call_operand.vmem [shape: f32[8,512], index: 26, kind: output, shape index: {14}]  }
   0x1   :  { %3630 = sst [smem:[#allocation3_spill]] %s3600_s0  ;;  %v32_v0 = vstv %s3611_s11 }
   0x2   :  { %3631 = sst [smem:[#allocation4_spill]] %s3601_s1  ;;  %33 = vst [vmem:[#allocation2] sm:$0x1] %v32_v0 }
   0x3   :  { %3632 = sst [smem:[#allocation5_spill]] %s3602_s2 }
   0x4   :  { %3633 = sst [smem:[#allocation6_spill]] %s3603_s3 }
   0x5   :  { %3634 = sst [smem:[#allocation7_spill]] %s3604_s4 }
   0x6   :  { %3635 = sst [smem:[#allocation8_spill]] %s3605_s5 }
   0x7   :  { %3636 = sst [smem:[#allocation9_spill]] %s3606_s6 }
   0x8   :  { %3637 = sst [smem:[#allocation10_spill]] %s3607_s7  ;;  %s3223_s7 = smov 0  }
   0x9   :  { %3638 = sst [smem:[#allocation11_spill]] %s3608_s8 }
   0xa   :  { %3639 = sst [smem:[#allocation12_spill]] %s3609_s9 }
   0xb   :  { %3640 = sst [smem:[#allocation13_spill]] %s3610_s10 }
   0xc LB: > { %s2879_s28 = sadd.s32 4294967295, %s3080_s7   ;;  %p2883_p0 = scmp.ge.s32.totalorder %s3080_s7, 1  ;;  %s3080_s7 = sphi %s3223_s7, %s39_s7  }
   0xd   : > { %p777_p1 = scmp.lt.s32.totalorder %s3080_s7, 3 }
   0xf   : > { %p778_p2 = pnand %p2883_p0, %p777_p1 }
  0x10   : > { %s2884_s8 = sshll.u32 (!%p778_p2), %s2879_s28, 1  ;;  %s3641_s11 = sld [smem:[#allocation8_spill]] (!%p778_p2) }
  0x11   : > { %781 = sbr.rel (%p778_p2) target bundleno = 926 (0x39e), region = 68  ;;  %p931_p3 = scmp.lt.s32.totalorder (!%p778_p2), %s2884_s8, 3 }
  0x12   : > { %s3642_s10 = sld [smem:[#allocation3_spill]] (!%p778_p2)  ;;  %s3083_s9 = smov (!%p778_p2), 120  }
  0x13   : > { %s3643_s3 = sld [smem:[#allocation11_spill]] (!%p778_p2) }
  0x14   : > { %s3644_s29 = sld [smem:[#allocation4_spill]] (!%p778_p2) }
  0x15   : > { %s3646_s27 = sld [smem:[#allocation12_spill]] (!%p778_p2) }
  0x16   : > { %v1045_v1 = vld [vmem:[%s3641_s11 + $0x8] sm:$0xff]  ;;  %v3082_v2 = vmov 0   ;;  %v1044_v3 = vld [vmem:[%s3641_s11] sm:$0xff]  ;;  %s3659_s8 = smov (!%p931_p3, %s2884_s8), 3  ;;  %s3084_s11 = smov 122   ;;  %vm1074_vm0 = vcmask 1043456  }
  0x17   : > { %3035 = vset.pattern.permute.xlu0 %v3082_v2  ;;  %3036 = vset.pattern.permute.xlu1 %v3082_v2  ;;  %s3240_s30 = sshll.u32 %s3659_s8, 2  ;;  %vm1067_vm1 = vcmask 31744   ;;  %v1051_v12 = vld [vmem:[#allocation2] sm:$0x1]  ;;  %vm1139_vm2 = vcmask 1041408   ;;  %vm1136_vm3 = vcmask 15360   ;;  %s963_s28 = scalar_lea.vmem %s3613_s13, %s3659_s8 }
  0x18   : > { %1060 = vperm.xlu0 %3035, %v1045_v1   ;;  %1055 = vperm.xlu1 %3036, %v1044_v3   ;;  %s934_s6 = scalar_lea.vmem %s3642_s10, %s3240_s30  ;;  %s3645_s10 = sld [smem:[#allocation7_spill]]  ;;  %vm1187_vm4 = vcmask 1045504   ;;  %vm1184_vm5 = vcmask 48128   ;;  %vm1305_vm6 = vcmask 64512   ;;  %vm1390_vm14 = vcmask 1040384  }
  0x19   : > { %3037 = vset.pattern.permute.xlu2 %v3082_v2  ;;  %v1052_v4 = vld [vmem:[%s934_s6] sm:$0xff]  ;;  %s3648_s6 = sld [smem:[#allocation9_spill]]  ;;  %s2891_s4 = sshll.u32 %s3659_s8, 1 }
  0x1a   : > { %v3249_v5 = vld [vmem:[%s3643_s3] sm:$0xf]  ;;  %1064 = vst [vmem:[#allocation1] ss:$2 sm:$0xff] %v1052_v4  ;;  %s940_s0 = scalar_lea.vmem %s3644_s29, %s3240_s30  ;;  %s3336_s3 = sshll.u32 %s3659_s8, 3 }
  0x1b   : > { %v1398_v6 = vld [vmem:[%s940_s0] sm:$0xff]  ;;  %s3647_s0 = sld [smem:[#allocation5_spill]]  ;;  %s1010_s29 = scalar_lea.vmem %s3621_s21, %s3336_s3 }
  0x1c   : > { %v1049_v8 = vld [vmem:[%s3646_s27] sm:$0xf]  ;;  %s3649_s27 = sld [smem:[#allocation13_spill]] }
  0x1d   : > { %s3650_s2 = sld [smem:[#allocation10_spill]] }
  0x1e   : > { %v3260_v7 = vld [vmem:[%s3645_s10] sm:$0xff]  ;;  %v3274_v11 = vld [vmem:[%s3645_s10 + $0x8] sm:$0xff] }
  0x1f   : > { %v3289_v17 = vld [vmem:[%s3648_s6] sm:$0xf] }
  0x20   : > { %1232 = vrot.lane.b32.xlu0 %v3249_v5, %s3083_s9  ;;  %1130 = vrot.lane.b32.xlu1 %v3249_v5, %s3084_s11 }
  0x21   : > { %v1065_v9 = vld.sshfl [vmem:[#allocation1] sm:$0xff pattern:$0x75316420]  ;;  %v1066_v10 = vld.sshfl [vmem:[#allocation1 + $0x8] sm:$0xff pattern:$0x75316420]  ;;  %s946_s9 = scalar_lea.vmem %s3647_s0, %s3240_s30  ;;  %1694 = vrot.lane.b32.xlu2 %v3289_v17, %s3084_s11  ;;  %s958_s11 = scalar_lea.vmem %s3612_s12, %s3240_s30 }
  0x22   : > { %2920 = vmatpush.msk.msra.mxu0 %vm1074_vm0, %v1065_v9  ;;  %2923 = vmatpush.msk.msra.mxu1 %vm1074_vm0, %v1066_v10  ;;  %1400 = vst [vmem:[#allocation1] ss:$2 sm:$0xff] %v1398_v6  ;;  %v1907_v15 = vld [vmem:[%s946_s9] sm:$0xff]  ;;  %s3655_s9 = sld [smem:[#allocation6_spill]]  ;;  %s969_s0 = scalar_lea.vmem %s3614_s14, %s3240_s30 }
  0x23   : > { %2921 = vmatmul.msk.f32.vlgmr.msra.gmra.mxu0 %vm1067_vm1, %v3260_v7  ;;  %2924 = vmatmul.msk.f32.vlgmr.msra.gmra.mxu1 %vm1067_vm1, %v3260_v7  ;;  %v1050_v35 = vld [vmem:[%s3649_s27] sm:$0x1] }
  0x24   : > { %v1047_v9 = vld [vmem:[%s3650_s2] sm:$0xf] }
  0x28   : > { %1286 = vperm.xlu0 %3035, %v1049_v8   ;;  %1301 = vperm.xlu1 %3036, %v1051_v12   ;;  %s952_s2 = scalar_lea.vmem %s3655_s9, %s2891_s4  ;;  %s1034_s9 = scalar_lea.vmem %s3625_s25, %s3336_s3 }
  0x29   : > { %v1401_v13 = vld.sshfl [vmem:[#allocation1] sm:$0xff pattern:$0x75316420]  ;;  %v1402_v14 = vld.sshfl [vmem:[#allocation1 + $0x8] sm:$0xff pattern:$0x75316420]  ;;  %1782 = vperm.xlu2 %3037, %v1047_v9  }
  0x2a   : > { %1909 = vst [vmem:[#allocation1] ss:$2 sm:$0xff] %v1907_v15  ;;  %v1968_v9 = vld [vmem:[%s952_s2] sm:$0xf]  ;;  %s986_s2 = scalar_lea.vmem %s3617_s17, %s3240_s30 }
  0x2b   : > { %2922 = vmatmul.msk.f32.gmra.mxu0 %vm1067_vm1, %v3274_v11  ;;  %2925 = vmatmul.msk.f32.gmra.mxu1 %vm1067_vm1, %v3274_v11 }
  0x8a   : > { %v3284_v16 = vpop.permute.xlu1 %1055  ;;  %v3294_v22 = vpop.permute.xlu0 %1060 }
  0x92   : > { %v3296_v25 = vpop.permute.xlu1 %1130  ;;  %v3308_v34 = vpop.permute.xlu0 %1232 }
  0x9a   : > { %v3344_v50 = vpop.permute.xlu0 %1286  ;;  %v1302_v51 = vpop.permute.xlu1 %1301 }
  0x9b   : > { %v3348_v58 = vperm.slane %v1302_v51, 0 }
  0xa0   : > { %v1096_v18 = vpop.f32.mrf.mxu0  ;;  %v1119_v19 = vpop.f32.mrf.mxu1 }
  0xa1   : > { %v1097_v20 = vadd.f32 %v1096_v18, %v3284_v16  ;;  %v1120_v21 = vadd.f32 %v1119_v19, %v3284_v16 }
  0xa3   : > { %v1125_v23 = vmax.f32 %v1097_v20, 0.0  ;;  %v1126_v24 = vmax.f32 %v1120_v21, 0.0 }
  0xa5   : > { %v1134_v26 = vrot.slane %v1125_v23, 6  ;;  %v1135_v27 = vrot.slane %v1126_v24, 6 }
  0xa7   : > { %2926 = vmatpush.msk.msra.mxu2 %vm1139_vm2, %v1134_v26  ;;  %2928 = vmatpush.msk.msra.mxu3 %vm1139_vm2, %v1135_v27 }
  0xa8   : > { %v1099_v28 = vpop.f32.mrf.mxu0  ;;  %v1122_v29 = vpop.f32.mrf.mxu1  ;;  %2927 = vmatmul.msk.f32.vlgmr.msra.gmra.mxu2 %vm1136_vm3, %v3296_v25  ;;  %2929 = vmatmul.msk.f32.vlgmr.msra.gmra.mxu3 %vm1136_vm3, %v3296_v25 }
  0xa9   : > { %v1100_v30 = vadd.f32 %v1099_v28, %v3294_v22  ;;  %v1123_v31 = vadd.f32 %v1122_v29, %v3294_v22  ;;  %2930 = vmatpush.msk.msrb.mxu2 %vm1187_vm4, %v1125_v23  ;;  %2932 = vmatpush.msk.msrb.mxu3 %vm1187_vm4, %v1126_v24 }
  0xab   : > { %1324 = vmatpush.msra.mxu2 %v1125_v23  ;;  %1344 = vmatpush.msra.mxu3 %v1126_v24  ;;  %v1127_v32 = vmax.f32 %v1100_v30, 0.0  ;;  %v1128_v33 = vmax.f32 %v1123_v31, 0.0 }
  0xad   : > { %2934 = vmatpush.msk.msrb.mxu0 %vm1074_vm0, %v1127_v32  ;;  %2936 = vmatpush.msk.msrb.mxu1 %vm1074_vm0, %v1128_v33 }
  0xae   : > { %2935 = vmatmul.msk.f32.vlgmr.msrb.gmra.mxu0 %vm1067_vm1, %v3308_v34  ;;  %2937 = vmatmul.msk.f32.vlgmr.msrb.gmra.mxu1 %vm1067_vm1, %v3308_v34 }
  0xaf   : > { %2942 = vmatpush.msk.msra.mxu0 %vm1074_vm0, %v1401_v13  ;;  %2945 = vmatpush.msk.msra.mxu1 %vm1074_vm0, %v1402_v14  ;;  %v3375_v13 = vpop.permute.xlu2 %1694 }
  0xb0   : > { %2931 = vmatmul.msk.f32.vlgmr.msrb.gmra.mxu2 %vm1184_vm5, %v3249_v5  ;;  %2933 = vmatmul.msk.f32.vlgmr.msrb.gmra.mxu3 %vm1184_vm5, %v3249_v5 }
  0xb6   : > { %2943 = vmatmul.msk.f32.vlgmr.msra.gmra.mxu0 %vm1067_vm1, %v3260_v7  ;;  %2946 = vmatmul.msk.f32.vlgmr.msra.gmra.mxu1 %vm1067_vm1, %v3260_v7 }
  0xb8   : > { %2938 = vmatmul.msk.f32.vlgmr.msra.gmra.mxu2 %vm1305_vm6, %v1050_v35  ;;  %2939 = vmatmul.msk.f32.vlgmr.msra.gmra.mxu3 %vm1305_vm6, %v1050_v35 }
  0xbe   : > { %2944 = vmatmul.msk.f32.gmra.mxu0 %vm1067_vm1, %v3274_v11  ;;  %2947 = vmatmul.msk.f32.gmra.mxu1 %vm1067_vm1, %v3274_v11 }
 0x12b   : > { %v1161_v36 = vpop.f32.mrf.mxu2  ;;  %v1181_v37 = vpop.f32.mrf.mxu3 }
 0x12c   : > { %v1259_v38 = vpop.f32.mrf.mxu0  ;;  %v1279_v39 = vpop.f32.mrf.mxu1 }
 0x133   : > { %v1209_v40 = vpop.f32.mrf.mxu2  ;;  %v1229_v41 = vpop.f32.mrf.mxu3 }
 0x134   : > { %v1210_v42 = vadd.f32 %v1209_v40, %v1161_v36  ;;  %v1230_v43 = vadd.f32 %v1229_v41, %v1181_v37  ;;  %v1424_v44 = vpop.f32.mrf.mxu0  ;;  %v1447_v45 = vpop.f32.mrf.mxu1  ;;  %v1393_v40 = vlaneseq }
 0x135   : > { %v1425_v46 = vadd.f32 %v1424_v44, %v3284_v16  ;;  %v1448_v47 = vadd.f32 %v1447_v45, %v3284_v16 }
 0x136   : > { %v1282_v48 = vadd.f32 %v1259_v38, %v1210_v42  ;;  %v1283_v49 = vadd.f32 %v1279_v39, %v1230_v43 }
 0x137   : > { %v1453_v52 = vmax.f32 %v1425_v46, 0.0  ;;  %v1454_v53 = vmax.f32 %v1448_v47, 0.0 }
 0x138   : > { %v1290_v54 = vadd.f32 %v3344_v50, %v1283_v49  ;;  %v1289_v55 = vadd.f32 %v3344_v50, %v1282_v48 }
 0x139   : > { %1474 = vmatpush.msrb.mxu2 %v1453_v52  ;;  %1494 = vmatpush.msrb.mxu3 %v1454_v53  ;;  %v1545_v56 = vrot.slane %v1453_v52, 6  ;;  %v1546_v57 = vrot.slane %v1454_v53, 6  ;;  %1457 = vst [vmem:[%s1010_s29] sm:$0xff] %v1453_v52 }
 0x13a   : > { %2956 = vmatpush.msk.msrb.mxu0 %vm1187_vm4, %v1453_v52  ;;  %2958 = vmatpush.msk.msrb.mxu1 %vm1187_vm4, %v1454_v53  ;;  %1458 = vst [vmem:[%s1010_s29 + $0x8] sm:$0xff] %v1454_v53  ;;  %3038 = vtanh.f32 %v1290_v54  ;;  %s1040_s29 = scalar_lea.vmem %s3626_s26, %s3336_s3 }
 0x13b   : > { %2948 = vmatmul.msk.f32.vlgmr.msrb.gmra.mxu2 %vm1305_vm6, %v1050_v35  ;;  %2949 = vmatmul.msk.f32.vlgmr.msrb.gmra.mxu3 %vm1305_vm6, %v1050_v35  ;;  %v1326_v59 = vpop.f32.mrf.mxu2  ;;  %v1346_v60 = vpop.f32.mrf.mxu3  ;;  %3040 = vtanh.f32 %v1289_v55  ;;  %vm3406_vm6 = vcmp.lt.s32.totalorder %v1393_v40, 256 }
 0x13c   : > { %2952 = vmatpush.msk.msra.mxu2 %vm1139_vm2, %v1545_v56  ;;  %2954 = vmatpush.msk.msra.mxu3 %vm1139_vm2, %v1546_v57  ;;  %v1327_v61 = vadd.f32 %v1326_v59, %v3348_v58  ;;  %v1347_v62 = vadd.f32 %v1346_v60, %v3348_v58  ;;  %v1427_v63 = vpop.f32.mrf.mxu0  ;;  %v1450_v0 = vpop.f32.mrf.mxu1 }
 0x13d   : > { %v1428_v1 = vadd.f32 %v1427_v63, %v3294_v22  ;;  %v1451_v2 = vadd.f32 %v1450_v0, %v3294_v22  ;;  %2957 = vmatmul.msk.f32.vlgmr.msrb.gmra.mxu0 %vm1184_vm5, %v3249_v5  ;;  %2959 = vmatmul.msk.f32.vlgmr.msrb.gmra.mxu1 %vm1184_vm5, %v3249_v5 }
 0x13e   : > { %v2940_v3 = vmul.f32 -1.442695, %v1327_v61  ;;  %v2941_v4 = vmul.f32 -1.442695, %v1347_v62 }
 0x13f   : > { %v1455_v6 = vmax.f32 %v1428_v1, 0.0  ;;  %v1456_v8 = vmax.f32 %v1451_v2, 0.0 }
 0x140   : > { %3042 = vpow2.f32 %v2940_v3  ;;  %v3039_v10 = vpop.eup %3038 }
 0x141   : > { %3044 = vpow2.f32 %v2941_v4  ;;  %2960 = vmatpush.msk.msrb.mxu2 %vm1074_vm0, %v1455_v6  ;;  %2962 = vmatpush.msk.msrb.mxu3 %vm1074_vm0, %v1456_v8  ;;  %v1295_v12 = vrot.slane %v3039_v10, 4  ;;  %v3041_v14 = vpop.eup %3040  ;;  %v3424_v4 = vld.sshfl [vmem:[#allocation1 + $0x8] sm:$0xff pattern:$0x75316420] }
 0x142   : > { %2964 = vmatpush.msk.msra.mxu0 %vm1074_vm0, %v1455_v6  ;;  %2966 = vmatpush.msk.msra.mxu1 %vm1074_vm0, %v1456_v8 }
 0x143   : > { %2953 = vmatmul.msk.f32.vlgmr.msra.gmra.mxu2 %vm1136_vm3, %v3296_v25  ;;  %2955 = vmatmul.msk.f32.vlgmr.msra.gmra.mxu3 %vm1136_vm3, %v3296_v25  ;;  %v1296_v15 = vsel %vm1074_vm0, %v3041_v14, %v1295_v12 }
 0x144   : > { %2968 = vmatpush.msk.msra.mxu2 %vm1187_vm4, %v1453_v52  ;;  %2970 = vmatpush.msk.msra.mxu3 %vm1187_vm4, %v1454_v53  ;;  %1298 = vst [vmem:[%s958_s11] sm:$0xff] %v1296_v15  ;;  %s975_s11 = scalar_lea.vmem %s3615_s15, %s3240_s30 }
 0x145   : > { %2965 = vmatmul.msk.f32.vlgmr.msra.gmra.mxu0 %vm1067_vm1, %v3375_v13  ;;  %2967 = vmatmul.msk.f32.vlgmr.msra.gmra.mxu1 %vm1067_vm1, %v3375_v13 }
 0x146   : > { %v3043_v18 = vpop.eup %3042 }
 0x147   : > { %v3045_v19 = vpop.eup %3044  ;;  %v1355_v20 = vadd.f32 1.0, %v3043_v18 }
 0x148   : > { %v1356_v21 = vadd.f32 1.0, %v3045_v19 }
 0x149   : > { %3046 = vrcp.f32 %v1355_v20  ;;  %vm1362_vm9 = vweird.f32 %v1355_v20  ;;  %v1368_v36 = vand.u32 2147483648, %v1355_v20  ;;  %v1366_v38 = vand.u32 2147483647, %v1355_v20 }
 0x14a   : > { %3048 = vrcp.f32 %v1356_v21  ;;  %v1383_v31 = vand.u32 2147483648, %v1356_v21  ;;  %v1381_v33 = vand.u32 2147483647, %v1356_v21  ;;  %vm1377_vm11 = vweird.f32 %v1356_v21 }
 0x14b   : > { %2961 = vmatmul.msk.f32.vlgmr.msrb.gmra.mxu2 %vm1067_vm1, %v3308_v34  ;;  %2963 = vmatmul.msk.f32.vlgmr.msrb.gmra.mxu3 %vm1067_vm1, %v3308_v34  ;;  %v1369_v44 = vor.u32 1.1754944e-38, %v1368_v36  ;;  %vm1367_vm15 = vcmp.eq.f32.partialorder %v1366_v38, 8.507059e+37 }
 0x14c   : > { %v1384_v41 = vor.u32 1.1754944e-38, %v1383_v31  ;;  %vm1382_vm13 = vcmp.eq.f32.partialorder %v1381_v33, 8.507059e+37 }
 0x14f   : > { %v3047_v23 = vpop.eup %3046 }
 0x150   : > { %v3049_v24 = vpop.eup %3048  ;;  %v1358_v26 = vmul.f32 %v3047_v23, %v1355_v20  ;;  %vm1363_vm7 = vweird.f32 %v3047_v23 }
 0x151   : > { %v1373_v27 = vmul.f32 %v3049_v24, %v1356_v21  ;;  %vm1378_vm8 = vweird.f32 %v3049_v24  ;;  %vm3396_vm10 = vmor %vm1362_vm9, %vm1363_vm7 }
 0x152   : > { %v1359_v28 = vsub.f32 1.0, %v1358_v26  ;;  %vm1379_vm12 = vmor %vm1377_vm11, %vm1378_vm8 }
 0x153   : > { %v1374_v29 = vsub.f32 1.0, %v1373_v27  ;;  %2969 = vmatmul.msk.f32.vlgmr.msra.gmra.mxu2 %vm1184_vm5, %v3289_v17  ;;  %2971 = vmatmul.msk.f32.vlgmr.msra.gmra.mxu3 %vm1184_vm5, %v3289_v17  ;;  %v3429_v27 = vpop.permute.xlu2 %1782 }
 0x154   : > { %v1360_v30 = vmul.f32 %v3047_v23, %v1359_v28 }
 0x155   : > { %v1375_v32 = vmul.f32 %v3049_v24, %v1374_v29 }
 0x156   : > { %v1361_v35 = vadd.f32 %v3047_v23, %v1360_v30 }
 0x157   : > { %v1376_v39 = vadd.f32 %v3049_v24, %v1375_v32 }
 0x158   : > { %v1365_v42 = vsel %vm3396_vm10, %v3047_v23, %v1361_v35 }
 0x159   : > { %v1380_v43 = vsel %vm1379_vm12, %v3049_v24, %v1376_v39  ;;  %v1370_v48 = vsel %vm1367_vm15, %v1369_v44, %v1365_v42 }
 0x15a   : > { %v1385_v45 = vsel %vm1382_vm13, %v1384_v41, %v1380_v43 }
 0x15b   : > { %v1389_v46 = vrot.slane %v1385_v45, 7 }
 0x15d   : > { %v1391_v49 = vsel %vm1390_vm14, %v1370_v48, %v1389_v46 }
 0x15e   : > { %1397 = vst.msk [vmem:[%s963_s28] sm:$0x3] %vm3406_vm6, %v1391_v49  ;;  %s980_s28 = scalar_lea.vmem %s3616_s16, %s3659_s8 }
 0x1ba   : > { %v1612_v63 = vpop.f32.mrf.mxu0  ;;  %v1632_v0 = vpop.f32.mrf.mxu1 }
 0x1be   : > { %v1476_v51 = vpop.f32.mrf.mxu2  ;;  %v1496_v52 = vpop.f32.mrf.mxu3 }
 0x1bf   : > { %v1477_v53 = vadd.f32 %v1476_v51, %v3348_v58  ;;  %v1497_v54 = vadd.f32 %v1496_v52, %v3348_v58  ;;  %v3422_v58 = vld.sshfl [vmem:[#allocation1] sm:$0xff pattern:$0x75316420] }
 0x1c0   : > { %1970 = vst [vmem:[#allocation1] ss:$4 sm:$0xff] %v1968_v9 }
 0x1c1   : > { %v2950_v55 = vmul.f32 -1.442695, %v1477_v53  ;;  %v2951_v56 = vmul.f32 -1.442695, %v1497_v54 }
 0x1c2   : > { %v1715_v23 = vpop.f32.mrf.mxu0  ;;  %v1735_v24 = vpop.f32.mrf.mxu1 }
 0x1c3   : > { %3050 = vpow2.f32 %v2950_v55 }
 0x1c4   : > { %3052 = vpow2.f32 %v2951_v56 }
 0x1c6   : > { %v1568_v57 = vpop.f32.mrf.mxu2  ;;  %v1588_v59 = vpop.f32.mrf.mxu3 }
 0x1c7   : > { %v1613_v2 = vadd.f32 %v1612_v63, %v1568_v57  ;;  %v1633_v3 = vadd.f32 %v1632_v0, %v1588_v59  ;;  %v1971_v47 = vld.sshfl [vmem:[#allocation1] sm:$0xff pattern:$0x73625140] }
 0x1c9   : > { %v3051_v60 = vpop.eup %3050 }
 0x1ca   : > { %v3053_v61 = vpop.eup %3052  ;;  %v3416_v62 = vadd.f32 1.0, %v3051_v60 }
 0x1cb   : > { %v1506_v1 = vadd.f32 1.0, %v3053_v61 }
 0x1cc   : > { %3054 = vrcp.f32 %v3416_v62  ;;  %vm1512_vm8 = vweird.f32 %v3416_v62  ;;  %v1518_v39 = vand.u32 2147483648, %v3416_v62  ;;  %v1516_v44 = vand.u32 2147483647, %v3416_v62 }
 0x1cd   : > { %3056 = vrcp.f32 %v1506_v1  ;;  %v1533_v29 = vand.u32 2147483648, %v1506_v1  ;;  %v1531_v37 = vand.u32 2147483647, %v1506_v1  ;;  %vm1527_vm11 = vweird.f32 %v1506_v1 }
 0x1ce   : > { %v1658_v6 = vpop.f32.mrf.mxu2  ;;  %v1678_v8 = vpop.f32.mrf.mxu3  ;;  %v1519_v53 = vor.u32 1.1754944e-38, %v1518_v39  ;;  %vm1517_vm15 = vcmp.eq.f32.partialorder %v1516_v44, 8.507059e+37 }
 0x1cf   : > { %v1681_v10 = vadd.f32 %v1658_v6, %v1613_v2  ;;  %v1682_v12 = vadd.f32 %v1678_v8, %v1633_v3  ;;  %v1534_v46 = vor.u32 1.1754944e-38, %v1533_v29  ;;  %vm1532_vm13 = vcmp.eq.f32.partialorder %v1531_v37, 8.507059e+37  ;;  %v1972_v3 = vld.sshfl [vmem:[#allocation1 + $0x8] sm:$0xff pattern:$0x73625140] }
 0x1d1   : > { %v1684_v14 = vadd.f32 %v1682_v12, %v3344_v50  ;;  %v1683_v18 = vadd.f32 %v1681_v10, %v3344_v50 }
 0x1d2   : > { %v3055_v15 = vpop.eup %3054 }
 0x1d3   : > { %v3057_v19 = vpop.eup %3056  ;;  %v1508_v20 = vmul.f32 %v3055_v15, %v3416_v62  ;;  %3058 = vtanh.f32 %v1684_v14  ;;  %vm1513_vm7 = vweird.f32 %v3055_v15 }
 0x1d4   : > { %v1523_v21 = vmul.f32 %v3057_v19, %v1506_v1  ;;  %3060 = vtanh.f32 %v1683_v18  ;;  %vm1528_vm9 = vweird.f32 %v3057_v19  ;;  %vm3435_vm10 = vmor %vm1512_vm8, %vm1513_vm7 }
 0x1d5   : > { %v1509_v26 = vsub.f32 1.0, %v1508_v20  ;;  %vm1529_vm12 = vmor %vm1527_vm11, %vm1528_vm9 }
 0x1d6   : > { %v1524_v28 = vsub.f32 1.0, %v1523_v21  ;;  %v1757_v30 = vpop.f32.mrf.mxu2  ;;  %v1777_v31 = vpop.f32.mrf.mxu3 }
 0x1d7   : > { %v1510_v32 = vmul.f32 %v3055_v15, %v1509_v26  ;;  %v1758_v33 = vadd.f32 %v1757_v30, %v1715_v23  ;;  %v1778_v35 = vadd.f32 %v1777_v31, %v1735_v24 }
 0x1d8   : > { %v1525_v36 = vmul.f32 %v3057_v19, %v1524_v28 }
 0x1d9   : > { %v1511_v38 = vadd.f32 %v3055_v15, %v1510_v32  ;;  %v1785_v40 = vadd.f32 %v3429_v27, %v1758_v33  ;;  %v1786_v41 = vadd.f32 %v3429_v27, %v1778_v35  ;;  %v3059_v42 = vpop.eup %3058 }
 0x1da   : > { %v1526_v45 = vadd.f32 %v3057_v19, %v1525_v36  ;;  %v1689_v48 = vrot.slane %v3059_v42, 4  ;;  %v3061_v49 = vpop.eup %3060 }
 0x1db   : > { %3062 = vtanh.f32 %v1785_v40  ;;  %v1515_v51 = vsel %vm3435_vm10, %v3055_v15, %v1511_v38 }
 0x1dc   : > { %v1530_v52 = vsel %vm1529_vm12, %v3057_v19, %v1526_v45  ;;  %3064 = vtanh.f32 %v1786_v41  ;;  %v1690_v55 = vsel %vm1074_vm0, %v3061_v49, %v1689_v48  ;;  %v1520_v57 = vsel %vm1517_vm15, %v1519_v53, %v1515_v51 }
 0x1dd   : > { %v1535_v54 = vsel %vm1532_vm13, %v1534_v46, %v1530_v52  ;;  %1692 = vst [vmem:[%s975_s11] sm:$0xff] %v1690_v55  ;;  %s1016_s11 = scalar_lea.vmem %s3622_s22, %s3336_s3 }
 0x1de   : > { %v1539_v56 = vrot.slane %v1535_v54, 7 }
 0x1e0   : > { %v1540_v59 = vsel %vm1390_vm14, %v1520_v57, %v1539_v56 }
 0x1e1   : > { %v3063_v60 = vpop.eup %3062  ;;  %1542 = vst.msk [vmem:[%s980_s28] sm:$0x3] %vm3406_vm6, %v1540_v59  ;;  %s1022_s28 = scalar_lea.vmem %s3623_s23, %s3336_s3 }
 0x1e2   : > { %v3065_v61 = vpop.eup %3064  ;;  %2972 = vmatpush.msk.msrb.mxu0 %vm1074_vm0, %v3063_v60  ;;  %v1795_v62 = vadd.f32 %v3063_v60, %v3061_v49 }
 0x1e3   : > { %v1791_v63 = vrot.slane %v3065_v61, 4  ;;  %2975 = vmatpush.msk.msrb.mxu1 %vm1074_vm0, %v3065_v61  ;;  %2973 = vmatmul.msk.f32.vlgmr.msrb.gmra.mxu0 %vm1067_vm1, %v3260_v7  ;;  %v1796_v0 = vadd.f32 %v3065_v61, %v3059_v42 }
 0x1e4   : > { %2976 = vmatmul.msk.f32.vlgmr.msrb.gmra.mxu1 %vm1067_vm1, %v3260_v7  ;;  %2978 = vmatpush.msk.msrb.mxu2 %vm1074_vm0, %v1795_v62 }
 0x1e5   : > { %v1792_v1 = vsel %vm1074_vm0, %v3063_v60, %v1791_v63  ;;  %v1799_v2 = vrot.slane %v1796_v0, 4  ;;  %2981 = vmatpush.msk.msrb.mxu3 %vm1074_vm0, %v1796_v0  ;;  %2979 = vmatmul.msk.f32.vlgmr.msrb.gmra.mxu2 %vm1067_vm1, %v3260_v7 }
 0x1e6   : > { %1794 = vst [vmem:[%s969_s0] sm:$0xff] %v1792_v1  ;;  %2982 = vmatmul.msk.f32.vlgmr.msrb.gmra.mxu3 %vm1067_vm1, %v3260_v7  ;;  %2984 = vmatpush.msk.msra.mxu0 %vm1074_vm0, %v3422_v58  ;;  %s1028_s0 = scalar_lea.vmem %s3624_s24, %s3336_s3 }
 0x1e7   : > { %v1800_v6 = vsel %vm1074_vm0, %v1795_v62, %v1799_v2  ;;  %2987 = vmatpush.msk.msra.mxu1 %vm1074_vm0, %v3424_v4  ;;  %2990 = vmatpush.msk.msra.mxu2 %vm1139_vm2, %v1971_v47 }
 0x1e8   : > { %1802 = vst [vmem:[%s986_s2] sm:$0xff] %v1800_v6  ;;  %2992 = vmatpush.msk.msra.mxu3 %vm1139_vm2, %v1972_v3  ;;  %s998_s2 = scalar_lea.vmem %s3619_s19, %s3240_s30 }
 0x1eb   : > { %2974 = vmatmul.msk.f32.gmra.mxu0 %vm1067_vm1, %v3274_v11 }
 0x1ec   : > { %2977 = vmatmul.msk.f32.gmra.mxu1 %vm1067_vm1, %v3274_v11 }
 0x1ed   : > { %2980 = vmatmul.msk.f32.gmra.mxu2 %vm1067_vm1, %v3274_v11 }
 0x1ee   : > { %2983 = vmatmul.msk.f32.gmra.mxu3 %vm1067_vm1, %v3274_v11 }
 0x1f3   : > { %2985 = vmatmul.msk.f32.vlgmr.msra.gmra.mxu0 %vm1067_vm1, %v3260_v7 }
 0x1f4   : > { %2988 = vmatmul.msk.f32.vlgmr.msra.gmra.mxu1 %vm1067_vm1, %v3260_v7 }
 0x1f5   : > { %2991 = vmatmul.msk.f32.vlgmr.msra.gmra.mxu2 %vm1136_vm3, %v3296_v25 }
 0x1f6   : > { %2993 = vmatmul.msk.f32.vlgmr.msra.gmra.mxu3 %vm1136_vm3, %v3296_v25 }
 0x1fb   : > { %2986 = vmatmul.msk.f32.gmra.mxu0 %vm1067_vm1, %v3274_v11 }
 0x1fc   : > { %2989 = vmatmul.msk.f32.gmra.mxu1 %vm1067_vm1, %v3274_v11 }
 0x260   : > { %v1824_v58 = vpop.f32.mrf.mxu0 }
 0x261   : > { %v1825_v4 = vadd.f32 %v1824_v58, %v3284_v16  ;;  %v1846_v8 = vpop.f32.mrf.mxu1 }
 0x262   : > { %v1847_v9 = vadd.f32 %v1846_v8, %v3284_v16 }
 0x263   : > { %v1851_v10 = vmax.f32 %v1825_v4, 0.0 }
 0x264   : > { %v1852_v12 = vmax.f32 %v1847_v9, 0.0 }
 0x265   : > { %1853 = vst [vmem:[%s1016_s11] sm:$0xff] %v1851_v10 }
 0x266   : > { %1854 = vst [vmem:[%s1016_s11 + $0x8] sm:$0xff] %v1852_v12  ;;  %s992_s11 = scalar_lea.vmem %s3618_s18, %s3240_s30 }
 0x268   : > { %v1827_v25 = vpop.f32.mrf.mxu0  ;;  %v1876_v14 = vpop.f32.mrf.mxu2 }
 0x269   : > { %v1849_v15 = vpop.f32.mrf.mxu1  ;;  %v1877_v18 = vadd.f32 %v1876_v14, %v3284_v16  ;;  %v1898_v19 = vpop.f32.mrf.mxu3 }
 0x26a   : > { %v1899_v20 = vadd.f32 %v1898_v19, %v3284_v16 }
 0x26b   : > { %v1903_v21 = vmax.f32 %v1877_v18, 0.0 }
 0x26c   : > { %v1904_v23 = vmax.f32 %v1899_v20, 0.0 }
 0x26d   : > { %1905 = vst [vmem:[%s1022_s28] sm:$0xff] %v1903_v21 }
 0x26e   : > { %1906 = vst [vmem:[%s1022_s28 + $0x8] sm:$0xff] %v1904_v23  ;;  %s1004_s28 = scalar_lea.vmem %s3620_s20, %s3240_s30 }
 0x270   : > { %v1879_v24 = vpop.f32.mrf.mxu2  ;;  %v1933_v26 = vpop.f32.mrf.mxu0 }
 0x271   : > { %v1901_v28 = vpop.f32.mrf.mxu3  ;;  %v1934_v29 = vadd.f32 %v1933_v26, %v3284_v16  ;;  %v1956_v30 = vpop.f32.mrf.mxu1 }
 0x272   : > { %v1957_v31 = vadd.f32 %v1956_v30, %v3284_v16 }
 0x273   : > { %v1962_v32 = vmax.f32 %v1934_v29, 0.0 }
 0x274   : > { %v1963_v33 = vmax.f32 %v1957_v31, 0.0 }
 0x275   : > { %1966 = vst [vmem:[%s1028_s0] sm:$0xff] %v1962_v32  ;;  %2994 = vmatpush.msk.msrb.mxu2 %vm1187_vm4, %v1962_v32 }
 0x276   : > { %1967 = vst [vmem:[%s1028_s0 + $0x8] sm:$0xff] %v1963_v33  ;;  %2996 = vmatpush.msk.msrb.mxu3 %vm1187_vm4, %v1963_v33  ;;  %2995 = vmatmul.msk.f32.vlgmr.msrb.gmra.mxu2 %vm1184_vm5, %v3249_v5 }
 0x277   : > { %2997 = vmatmul.msk.f32.vlgmr.msrb.gmra.mxu3 %vm1184_vm5, %v3249_v5 }
 0x278   : > { %v1936_v35 = vpop.f32.mrf.mxu0  ;;  %v1994_v5 = vpop.f32.mrf.mxu2 }
 0x279   : > { %v1937_v36 = vadd.f32 %v1936_v35, %v3294_v22  ;;  %v1959_v37 = vpop.f32.mrf.mxu1 }
 0x27a   : > { %v1960_v38 = vadd.f32 %v1959_v37, %v3294_v22  ;;  %v2014_v22 = vpop.f32.mrf.mxu3 }
 0x27b   : > { %v1964_v39 = vmax.f32 %v1937_v36, 0.0 }
 0x27c   : > { %v1965_v40 = vmax.f32 %v1960_v38, 0.0 }
 0x27d   : > { %2998 = vmatpush.msk.msrb.mxu0 %vm1074_vm0, %v1964_v39  ;;  %3002 = vmatpush.msk.msra.mxu2 %vm1074_vm0, %v1964_v39 }
 0x27e   : > { %3000 = vmatpush.msk.msrb.mxu1 %vm1074_vm0, %v1965_v40  ;;  %3004 = vmatpush.msk.msra.mxu3 %vm1074_vm0, %v1965_v40 }
 0x27f   : > { %2999 = vmatmul.msk.f32.vlgmr.msrb.gmra.mxu0 %vm1067_vm1, %v3308_v34  ;;  %3001 = vmatmul.msk.f32.vlgmr.msrb.gmra.mxu1 %vm1067_vm1, %v3308_v34 }
 0x280   : > { %3003 = vmatmul.msk.f32.vlgmr.msra.gmra.mxu2 %vm1067_vm1, %v3375_v13  ;;  %3005 = vmatmul.msk.f32.vlgmr.msra.gmra.mxu3 %vm1067_vm1, %v3375_v13 }
 0x281   : > { %3006 = vmatpush.msk.msra.mxu0 %vm1187_vm4, %v1962_v32  ;;  %3008 = vmatpush.msk.msra.mxu1 %vm1187_vm4, %v1963_v33 }
 0x287   : > { %3007 = vmatmul.msk.f32.vlgmr.msra.gmra.mxu0 %vm1184_vm5, %v3289_v17  ;;  %3009 = vmatmul.msk.f32.vlgmr.msra.gmra.mxu1 %vm1184_vm5, %v3289_v17 }
 0x2f9   : > { %v2040_v41 = vpop.f32.mrf.mxu2 }
 0x2fa   : > { %v2041_v34 = vadd.f32 %v2040_v41, %v1994_v5  ;;  %v2060_v42 = vpop.f32.mrf.mxu3 }
 0x2fb   : > { %v2061_v43 = vadd.f32 %v2060_v42, %v2014_v22 }
 0x2fc   : > { %v2086_v44 = vpop.f32.mrf.mxu0  ;;  %v2106_v45 = vpop.f32.mrf.mxu1 }
 0x2fd   : > { %v2109_v13 = vadd.f32 %v2086_v44, %v2041_v34  ;;  %v2110_v46 = vadd.f32 %v2106_v45, %v2061_v43 }
 0x2ff   : > { %v2112_v48 = vadd.f32 %v2110_v46, %v3344_v50  ;;  %v2111_v49 = vadd.f32 %v2109_v13, %v3344_v50 }
 0x301   : > { %3066 = vtanh.f32 %v2112_v48 }
 0x302   : > { %3068 = vtanh.f32 %v2111_v49 }
 0x303   : > { %v2138_v51 = vpop.f32.mrf.mxu2  ;;  %v2158_v52 = vpop.f32.mrf.mxu3 }
 0x304   : > { %v2178_v17 = vpop.f32.mrf.mxu0  ;;  %v2198_v53 = vpop.f32.mrf.mxu1 }
 0x305   : > { %v2179_v54 = vadd.f32 %v2178_v17, %v2138_v51  ;;  %v2199_v55 = vadd.f32 %v2198_v53, %v2158_v52 }
 0x307   : > { %v2201_v56 = vadd.f32 %v2179_v54, %v3429_v27  ;;  %v2202_v57 = vadd.f32 %v2199_v55, %v3429_v27  ;;  %v3067_v59 = vpop.eup %3066 }
 0x308   : > { %v2117_v60 = vrot.slane %v3067_v59, 4  ;;  %v3069_v50 = vpop.eup %3068 }
 0x309   : > { %3070 = vtanh.f32 %v2201_v56 }
 0x30a   : > { %3072 = vtanh.f32 %v2202_v57  ;;  %v2118_v61 = vsel %vm1074_vm0, %v3069_v50, %v2117_v60 }
 0x30b   : > { %2120 = vst [vmem:[%s998_s2] sm:$0xff] %v2118_v61 }
 0x30f   : > { %v3071_v62 = vpop.eup %3070 }
 0x310   : > { %v3073_v63 = vpop.eup %3072  ;;  %3010 = vmatpush.msk.msrb.mxu2 %vm1074_vm0, %v3071_v62  ;;  %v2211_v0 = vadd.f32 %v3071_v62, %v3069_v50 }
 0x311   : > { %v2207_v27 = vrot.slane %v3073_v63, 4  ;;  %3013 = vmatpush.msk.msrb.mxu3 %vm1074_vm0, %v3073_v63  ;;  %3011 = vmatmul.msk.f32.vlgmr.msrb.gmra.mxu2 %vm1067_vm1, %v3260_v7  ;;  %v2212_v47 = vadd.f32 %v3073_v63, %v3067_v59 }
 0x312   : > { %3014 = vmatmul.msk.f32.vlgmr.msrb.gmra.mxu3 %vm1067_vm1, %v3260_v7  ;;  %3016 = vmatpush.msk.msrb.mxu0 %vm1074_vm0, %v2211_v0 }
 0x313   : > { %v2208_v1 = vsel %vm1074_vm0, %v3071_v62, %v2207_v27  ;;  %v2215_v2 = vrot.slane %v2212_v47, 4  ;;  %3019 = vmatpush.msk.msrb.mxu1 %vm1074_vm0, %v2212_v47  ;;  %3017 = vmatmul.msk.f32.vlgmr.msrb.gmra.mxu0 %vm1067_vm1, %v3260_v7 }
 0x314   : > { %2210 = vst [vmem:[%s992_s11] sm:$0xff] %v2208_v1  ;;  %3020 = vmatmul.msk.f32.vlgmr.msrb.gmra.mxu1 %vm1067_vm1, %v3260_v7 }
 0x315   : > { %v2216_v3 = vsel %vm1074_vm0, %v2211_v0, %v2215_v2 }
 0x316   : > { %2218 = vst [vmem:[%s1004_s28] sm:$0xff] %v2216_v3 }
 0x319   : > { %3012 = vmatmul.msk.f32.gmra.mxu2 %vm1067_vm1, %v3274_v11 }
 0x31a   : > { %3015 = vmatmul.msk.f32.gmra.mxu3 %vm1067_vm1, %v3274_v11 }
 0x31b   : > { %3018 = vmatmul.msk.f32.gmra.mxu0 %vm1067_vm1, %v3274_v11 }
 0x31c   : > { %3021 = vmatmul.msk.f32.gmra.mxu1 %vm1067_vm1, %v3274_v11 }
 0x390   : > { %v2292_v6 = vpop.f32.mrf.mxu0 }
 0x391   : > { %v2293_v58 = vadd.f32 %v2292_v6, %v3284_v16  ;;  %v2314_v7 = vpop.f32.mrf.mxu1 }
 0x392   : > { %v2315_v4 = vadd.f32 %v2314_v7, %v3284_v16 }
 0x393   : > { %v2319_v8 = vmax.f32 %v2293_v58, 0.0 }
 0x394   : > { %v2320_v9 = vmax.f32 %v2315_v4, 0.0  ;;  %v2240_v10 = vpop.f32.mrf.mxu2 }
 0x395   : > { %2321 = vst [vmem:[%s1040_s29] sm:$0xff] %v2319_v8  ;;  %v2241_v12 = vadd.f32 %v2240_v10, %v3284_v16  ;;  %v2262_v25 = vpop.f32.mrf.mxu3 }
 0x396   : > { %2322 = vst [vmem:[%s1040_s29 + $0x8] sm:$0xff] %v2320_v9  ;;  %v2263_v11 = vadd.f32 %v2262_v25, %v3284_v16 }
 0x397   : > { %v2267_v14 = vmax.f32 %v2241_v12, 0.0 }
 0x398   : > { %v2268_v15 = vmax.f32 %v2263_v11, 0.0  ;;  %v2295_v18 = vpop.f32.mrf.mxu0 }
 0x399   : > { %2269 = vst [vmem:[%s1034_s9] sm:$0xff] %v2267_v14  ;;  %v2317_v19 = vpop.f32.mrf.mxu1 }
 0x39a   : > { %2270 = vst [vmem:[%s1034_s9 + $0x8] sm:$0xff] %v2268_v15 }
 0x39c   : > { %v2243_v20 = vpop.f32.mrf.mxu2 }
 0x39d   : > { %v2265_v21 = vpop.f32.mrf.mxu3 }
 0x39e PF: > { %s39_s7 = sadd.s32 1, %s3080_s7  }
 0x39f   : > { %p36_p4 = scmp.ge.s32.totalorder %s39_s7, 4  }
 0x3a1   :  { %38 = sbr.rel (!%p36_p4) target bundleno = 12 (0xc), region = 275 }

</bundles_post_ra>
